<compile_context>
chip_gen: v5e
topology: v5e:2x2
jax: 0.10.0
libtpu: 0.0.40
codegen_flags: <defaults>
</compile_context>

<pallas_src>
import jax
import jax.numpy as jnp
from jax import lax
from jax.experimental import pallas as pl
from jax.experimental.pallas import tpu as pltpu


def _round_up(x, m):
    return (x + m - 1) // m * m


def _vmem_limit_bytes():
    """Per-generation VMEM scoped limit (~3/4 of physical, capped), 32 MiB fallback."""
    try:
        cap = getattr(pltpu.get_tpu_info(), "vmem_capacity_bytes", None)
        if cap:
            return int(min(cap * 3 // 4, 100 * 1024 * 1024))
    except Exception:
        pass
    return 32 * 1024 * 1024


def _zero_border(ref, Hp, Wp):
    """Zero only the 1-pixel halo border of a (Hp+2, Wp+2, C) scratch slab."""
    C = ref.shape[-1]
    zrow = jnp.zeros((1, Wp + 2, C), ref.dtype)
    zcol = jnp.zeros((Hp + 2, 1, C), ref.dtype)
    ref[0:1, :, :] = zrow
    ref[Hp + 1:Hp + 2, :, :] = zrow
    ref[:, 0:1, :] = zcol
    ref[:, Wp + 1:Wp + 2, :] = zcol


def _conv3x3(xpad, w, Hp, Wp):
    """3x3 'same' conv on a zero-bordered slab.

    xpad: [Hp+2, Wp+2, C] activations (compute dtype, zero border).
    w:    [9*C, Cout] weights flattened in (ky, kx, cin) order.
    Returns [Hp*Wp, Cout] f32 (MXU accumulation in f32 via preferred_element_type).
    """
    C = xpad.shape[-1]
    Cout = w.shape[-1]
    if C >= 128:
        # Wide C: 9 accumulating K=C matmuls over direct slices — avoids
        # materializing the [Hp*Wp, 9*C] patches slab (vst-slot relief); on v7x
        # the MRB accumulates in place, on v5e/v6e the adds are cheap VPU filler.
        acc = jnp.zeros((Hp * Wp, Cout), jnp.float32)
        for k in range(9):
            ky, kx = divmod(k, 3)
            patch = xpad[ky:ky + Hp, kx:kx + Wp, :].reshape(Hp * Wp, C)
            acc = acc + jnp.dot(patch, w[k * C:(k + 1) * C, :],
                                preferred_element_type=jnp.float32)
        return acc
    # Narrow C: single big-K im2col matmul keeps the MXU contraction dim fed.
    cols = [xpad[ky:ky + Hp, kx:kx + Wp, :] for ky in range(3) for kx in range(3)]
    patches = jnp.concatenate(cols, axis=-1).reshape(Hp * Wp, 9 * C)
    return jnp.dot(patches, w, preferred_element_type=jnp.float32)


def down_conv_kernel(x_ref, w1_ref, b1_ref, w2_ref, b2_ref, o_ref,
                     xp_ref, x1p_ref):
    H, W, Cin = x_ref.shape
    Hp, Wp = H // 2, W // 2
    Cp = o_ref.shape[-1]                         # channel dim, padded to 128-multiple
    cdt = xp_ref.dtype                           # compute dtype (f32 or bf16)

    x = x_ref[...]                               # [H, W, Cin] f32

    # --- MaxPool2d(kernel=2, stride=2) -------------------------------------
    xh = jnp.max(x.reshape(Hp, 2, W, Cin), axis=1)          # row pool (free split)
    if Cin % 128 == 0:
        # Lane-aligned column pool: merge column pairs into lanes, max the halves.
        xr = xh.reshape(Hp, Wp, 2 * Cin)
        xp = jnp.maximum(xr[..., :Cin], xr[..., Cin:])
    else:
        xp = jnp.max(xh.reshape(Hp, Wp, 2, Cin), axis=2)    # [Hp, Wp, Cin]

    # --- conv1 (BN scale folded into weights) + bias + LeakyReLU ------------
    # Zero-bordered pooled tile in scratch = the conv's padding halo; only the
    # border is zeroed each step, the interior is overwritten.
    _zero_border(xp_ref, Hp, Wp)
    xp_ref[1:Hp + 1, 1:Wp + 1, :] = xp.astype(cdt)
    y1 = _conv3x3(xp_ref[...], w1_ref[...], Hp, Wp) + b1_ref[...]
    x1 = jnp.maximum(y1, 0.01 * y1)              # LeakyReLU, [Hp*Wp, Cp] f32
    # TODO(synk): Dropout(0.1) is identity here (eval-mode semantics, no RNG).

    # --- conv2 + bias + LeakyReLU + residual (y2 + x1) -----------------------
    _zero_border(x1p_ref, Hp, Wp)
    x1p_ref[1:Hp + 1, 1:Wp + 1, :] = x1.astype(cdt).reshape(Hp, Wp, Cp)
    y2 = _conv3x3(x1p_ref[...], w2_ref[...], Hp, Wp) + b2_ref[...]
    y2 = jnp.maximum(y2, 0.01 * y2)

    o_ref[...] = (y2 + x1).astype(o_ref.dtype)   # residual in f32, [Hp*Wp, Cp]


def down_conv_forward(x_nchw, params, *, compute_dtype=jnp.float32):
    # NCHW (PyTorch contract) -> NHWC once at the boundary; if the surrounding
    # model stays NHWC these transposes (extra HBM round trips) disappear.
    x = jnp.transpose(x_nchw, (0, 2, 3, 1)).astype(jnp.float32)
    N, H, W, Cin = x.shape
    # TODO(synk): PyTorch MaxPool2d(2) floors odd spatial sizes; only even H, W here.
    assert H % 2 == 0 and W % 2 == 0, "down_conv kernel requires even H and W"
    Hp, Wp = H // 2, W // 2
    Cout = params["b1"].shape[-1]

    # Pad Cout to a 128 multiple so the matmul N dim and the output store are
    # lane-dense (padded weight columns / bias entries are zero -> padded
    # output channels are exactly zero and get sliced off below).
    Cp = _round_up(Cout, 128)
    pad = Cp - Cout
    w1 = jnp.pad(params["w1_hwio"], ((0, 0), (0, 0), (0, 0), (0, pad)))
    w2 = jnp.pad(params["w2_hwio"], ((0, 0), (0, 0), (0, pad), (0, pad)))
    w1 = w1.reshape(9 * Cin, Cp).astype(compute_dtype)      # (ky,kx,cin) flattening
    w2 = w2.reshape(9 * Cp, Cp).astype(compute_dtype)
    b1 = jnp.pad(params["b1"], (0, pad)).reshape(1, Cp).astype(jnp.float32)
    b2 = jnp.pad(params["b2"], (0, pad)).reshape(1, Cp).astype(jnp.float32)

    flops = 2 * N * Hp * Wp * Cp * (9 * Cin + 9 * Cp)
    bytes_accessed = (x.size * 4 + N * Hp * Wp * Cp * 4
                      + w1.size * w1.dtype.itemsize + w2.size * w2.dtype.itemsize
                      + (b1.size + b2.size) * 4)

    out = pl.pallas_call(
        down_conv_kernel,
        out_shape=jax.ShapeDtypeStruct((N, Hp * Wp, Cp), jnp.float32),
        grid=(N,),
        in_specs=[
            # One image per grid step (batch axis squeezed out of the kernel ref).
            pl.BlockSpec((None, H, W, Cin), lambda b: (b, 0, 0, 0)),
            # Weights / biases: constant index_map -> stay VMEM-resident.
            pl.BlockSpec((9 * Cin, Cp), lambda b: (0, 0)),
            pl.BlockSpec((1, Cp), lambda b: (0, 0)),
            pl.BlockSpec((9 * Cp, Cp), lambda b: (0, 0)),
            pl.BlockSpec((1, Cp), lambda b: (0, 0)),
        ],
        out_specs=pl.BlockSpec((None, Hp * Wp, Cp), lambda b: (b, 0, 0)),
        scratch_shapes=[
            pltpu.VMEM((Hp + 2, Wp + 2, Cin), compute_dtype),   # padded pooled tile
            pltpu.VMEM((Hp + 2, Wp + 2, Cp), compute_dtype),    # padded conv1 output
        ],
        compiler_params=pltpu.CompilerParams(
            dimension_semantics=("parallel",),      # shard batch over v7x's 2 TCs
            vmem_limit_bytes=_vmem_limit_bytes(),
        ),
        cost_estimate=pl.CostEstimate(
            flops=flops, transcendentals=0, bytes_accessed=bytes_accessed),
    )(x, w1, b1, w2, b2)

    # Drop channel padding; layout plumbing (reshape/transpose) stays in the wrapper.
    out = out.reshape(N, Hp, Wp, Cp)[..., :Cout]
    return jnp.transpose(out, (0, 3, 1, 2))


def init_params(key, cin, cout, eps=1e-5):
    ks = jax.random.split(key, 8)
    # Conv weights in PyTorch layout [Cout, Cin, 3, 3].
    w1 = jax.random.normal(ks[0], (cout, cin, 3, 3), jnp.float32) * 0.1
    cb1 = jax.random.normal(ks[1], (cout,), jnp.float32) * 0.1
    g1 = 1.0 + 0.1 * jax.random.normal(ks[2], (cout,), jnp.float32)
    be1 = 0.1 * jax.random.normal(ks[3], (cout,), jnp.float32)
    w2 = jax.random.normal(ks[4], (cout, cout, 3, 3), jnp.float32) * 0.1
    cb2 = jax.random.normal(ks[5], (cout,), jnp.float32) * 0.1
    g2 = 1.0 + 0.1 * jax.random.normal(ks[6], (cout,), jnp.float32)
    be2 = 0.1 * jax.random.normal(ks[7], (cout,), jnp.float32)

    w1_hwio = jnp.transpose(w1, (2, 3, 1, 0))     # [3,3,Cin,Cout]
    w2_hwio = jnp.transpose(w2, (2, 3, 1, 0))     # [3,3,Cout,Cout]
    # BatchNorm eval with running_mean=0, running_var=1: scale = gamma/sqrt(1+eps).
    # TODO(synk): with real checkpoint stats, s = gamma*rsqrt(var+eps) and
    #             bias = beta + (conv_bias - mean) * s.
    s1 = g1 / jnp.sqrt(1.0 + eps)
    b1 = cb1 * s1 + be1                            # conv bias folded through BN
    s2 = g2 / jnp.sqrt(1.0 + eps)
    b2 = cb2 * s2 + be2
    return {
        # Kernel-ready params: BN scale folded into HWIO weights; per-channel bias.
        "w1_hwio": w1_hwio * s1, "b1": b1,
        "w2_hwio": w2_hwio * s2, "b2": b2,
        # Unfused copies, used only by the pure-JAX reference.
        "ref_w1": w1_hwio, "ref_s1": s1, "ref_b1": b1,
        "ref_w2": w2_hwio, "ref_s2": s2, "ref_b2": b2,
    }


def reference_forward(x_nchw, params):
    # Pure-JAX reference (XLA conv) for sanity checking the Pallas kernel.
    x = jnp.transpose(x_nchw, (0, 2, 3, 1))
    xp = lax.reduce_window(x, -jnp.inf, lax.max, (1, 2, 2, 1), (1, 2, 2, 1), "VALID")

    def conv(a, w):
        return lax.conv_general_dilated(a, w, (1, 1), "SAME",
                                        dimension_numbers=("NHWC", "HWIO", "NHWC"))

    y1 = conv(xp, params["ref_w1"]) * params["ref_s1"] + params["ref_b1"]
    x1 = jnp.where(y1 > 0, y1, 0.01 * y1)
    y2 = conv(x1, params["ref_w2"]) * params["ref_s2"] + params["ref_b2"]
    y2 = jnp.where(y2 > 0, y2, 0.01 * y2)
    return jnp.transpose(y2 + x1, (0, 3, 1, 2))


if __name__ == "__main__":
    key = jax.random.PRNGKey(0)
    kx, kp = jax.random.split(key)
    N, Cin, Cout, H, W = 2, 4, 8, 16, 16
    x = jax.random.normal(kx, (N, Cin, H, W), jnp.float32)   # NCHW, like PyTorch
    params = init_params(kp, Cin, Cout)

    ref = jax.block_until_ready(reference_forward(x, params))

    # f32 operands: must match the XLA reference tightly (exercises both the
    # im2col path for conv1 and the 9-dot accumulate path for conv2, Cp=128).
    out_f32 = jax.block_until_ready(down_conv_forward(x, params))
    assert out_f32.shape == (N, Cout, H // 2, W // 2), out_f32.shape
    assert jnp.allclose(out_f32, ref, atol=1e-4, rtol=1e-4), \
        float(jnp.max(jnp.abs(out_f32 - ref)))

    # bf16 operands with f32 MXU accumulation (v5e/v6e/v7x fast path).
    out_bf16 = jax.block_until_ready(
        down_conv_forward(x, params, compute_dtype=jnp.bfloat16))
    assert jnp.allclose(out_bf16, ref, atol=1e-1, rtol=1e-1), \
        float(jnp.max(jnp.abs(out_bf16 - ref)))

    print("KERNEL_OK")
</pallas_src>

<mosaic_0001>
module attributes {stable_mosaic.version = 11 : i64} {
  func.func @down_conv_kernel(%arg0: i32, %arg1: memref<1x16x16x4xf32, #tpu.memory_space<vmem>>, %arg2: memref<36x128xf32, #tpu.memory_space<vmem>>, %arg3: memref<1x128xf32, #tpu.memory_space<vmem>>, %arg4: memref<1152x128xf32, #tpu.memory_space<vmem>>, %arg5: memref<1x128xf32, #tpu.memory_space<vmem>>, %arg6: memref<1x64x128xf32, #tpu.memory_space<vmem>>, %arg7: memref<10x10x4xf32, #tpu.memory_space<vmem>>, %arg8: memref<10x10x128xf32, #tpu.memory_space<vmem>>) attributes {dimension_semantics = [#tpu.dimension_semantics<parallel>], iteration_bounds = array<i64: 2>, scalar_prefetch = 0 : i64, scratch_operands = 2 : i64, tpu.core_type = #tpu.core_type<tc>, window_params = [{transform_indices = @transform_0, window_bounds = array<i64: 1, 16, 16, 4>}, {pipeline_mode = #tpu.pipeline_mode<synchronous>, transform_indices = @transform_1, window_bounds = array<i64: 36, 128>}, {pipeline_mode = #tpu.pipeline_mode<synchronous>, transform_indices = @transform_2, window_bounds = array<i64: 1, 128>}, {pipeline_mode = #tpu.pipeline_mode<synchronous>, transform_indices = @transform_3, window_bounds = array<i64: 1152, 128>}, {pipeline_mode = #tpu.pipeline_mode<synchronous>, transform_indices = @transform_4, window_bounds = array<i64: 1, 128>}, {transform_indices = @transform_5, window_bounds = array<i64: 1, 64, 128>}]} {
    %c0 = arith.constant 0 : index
    %c0_0 = arith.constant 0 : index
    %c0_1 = arith.constant 0 : index
    %c0_2 = arith.constant 0 : index
    %0 = vector.load %arg1[%c0, %c0_0, %c0_1, %c0_2] : memref<1x16x16x4xf32, #tpu.memory_space<vmem>>, vector<1x16x16x4xf32>
    %1 = vector.shape_cast %0 : vector<1x16x16x4xf32> to vector<16x16x4xf32>
    %2 = vector.shape_cast %1 : vector<16x16x4xf32> to vector<8x2x16x4xf32>
    %cst = arith.constant dense<0xFF800000> : vector<8x16x4xf32>
    %3 = vector.multi_reduction <maximumf>, %2, %cst [1] : vector<8x2x16x4xf32> to vector<8x16x4xf32>
    %4 = vector.shape_cast %3 : vector<8x16x4xf32> to vector<8x8x2x4xf32>
    %cst_3 = arith.constant dense<0xFF800000> : vector<8x8x4xf32>
    %5 = vector.multi_reduction <maximumf>, %4, %cst_3 [2] : vector<8x8x2x4xf32> to vector<8x8x4xf32>
    %cst_4 = arith.constant 0.000000e+00 : f32
    %6 = vector.broadcast %cst_4 : f32 to vector<1x10x4xf32>
    %cst_5 = arith.constant 0.000000e+00 : f32
    %7 = vector.broadcast %cst_5 : f32 to vector<10x1x4xf32>
    %c0_6 = arith.constant 0 : index
    %c0_7 = arith.constant 0 : index
    %c0_8 = arith.constant 0 : index
    %8 = vector.load %arg7[%c0_6, %c0_7, %c0_8] : memref<10x10x4xf32, #tpu.memory_space<vmem>>, vector<1x10x4xf32>
    tpu.vector_store %arg7[%c0_6, %c0_7, %c0_8], %6 {strides = array<i32>} : memref<10x10x4xf32, #tpu.memory_space<vmem>>, vector<1x10x4xf32>,
    %c9 = arith.constant 9 : index
    %c0_9 = arith.constant 0 : index
    %c0_10 = arith.constant 0 : index
    %9 = vector.load %arg7[%c9, %c0_9, %c0_10] : memref<10x10x4xf32, #tpu.memory_space<vmem>>, vector<1x10x4xf32>
    tpu.vector_store %arg7[%c9, %c0_9, %c0_10], %6 {strides = array<i32>} : memref<10x10x4xf32, #tpu.memory_space<vmem>>, vector<1x10x4xf32>,
    %c0_11 = arith.constant 0 : index
    %c0_12 = arith.constant 0 : index
    %c0_13 = arith.constant 0 : index
    %10 = vector.load %arg7[%c0_11, %c0_12, %c0_13] : memref<10x10x4xf32, #tpu.memory_space<vmem>>, vector<10x1x4xf32>
    tpu.vector_store %arg7[%c0_11, %c0_12, %c0_13], %7 {strides = array<i32>} : memref<10x10x4xf32, #tpu.memory_space<vmem>>, vector<10x1x4xf32>,
    %c0_14 = arith.constant 0 : index
    %c9_15 = arith.constant 9 : index
    %c0_16 = arith.constant 0 : index
    %11 = vector.load %arg7[%c0_14, %c9_15, %c0_16] : memref<10x10x4xf32, #tpu.memory_space<vmem>>, vector<10x1x4xf32>
    tpu.vector_store %arg7[%c0_14, %c9_15, %c0_16], %7 {strides = array<i32>} : memref<10x10x4xf32, #tpu.memory_space<vmem>>, vector<10x1x4xf32>,
    %c1 = arith.constant 1 : index
    %c1_17 = arith.constant 1 : index
    %c0_18 = arith.constant 0 : index
    %12 = vector.load %arg7[%c1, %c1_17, %c0_18] : memref<10x10x4xf32, #tpu.memory_space<vmem>>, vector<8x8x4xf32>
    tpu.vector_store %arg7[%c1, %c1_17, %c0_18], %5 {strides = array<i32>} : memref<10x10x4xf32, #tpu.memory_space<vmem>>, vector<8x8x4xf32>,
    %c0_19 = arith.constant 0 : index
    %c0_20 = arith.constant 0 : index
    %c0_21 = arith.constant 0 : index
    %13 = vector.load %arg7[%c0_19, %c0_20, %c0_21] : memref<10x10x4xf32, #tpu.memory_space<vmem>>, vector<10x10x4xf32>
    %c0_22 = arith.constant 0 : index
    %c0_23 = arith.constant 0 : index
    %14 = vector.load %arg2[%c0_22, %c0_23] : memref<36x128xf32, #tpu.memory_space<vmem>>, vector<36x128xf32>
    %15 = vector.extract_strided_slice %13 {offsets = [0, 0, 0], sizes = [8, 8, 4], strides = [1, 1, 1]} : vector<10x10x4xf32> to vector<8x8x4xf32>
    %16 = vector.extract_strided_slice %13 {offsets = [0, 1, 0], sizes = [8, 8, 4], strides = [1, 1, 1]} : vector<10x10x4xf32> to vector<8x8x4xf32>
    %17 = vector.extract_strided_slice %13 {offsets = [0, 2, 0], sizes = [8, 8, 4], strides = [1, 1, 1]} : vector<10x10x4xf32> to vector<8x8x4xf32>
    %18 = vector.extract_strided_slice %13 {offsets = [1, 0, 0], sizes = [8, 8, 4], strides = [1, 1, 1]} : vector<10x10x4xf32> to vector<8x8x4xf32>
    %19 = vector.extract_strided_slice %13 {offsets = [1, 1, 0], sizes = [8, 8, 4], strides = [1, 1, 1]} : vector<10x10x4xf32> to vector<8x8x4xf32>
    %20 = vector.extract_strided_slice %13 {offsets = [1, 2, 0], sizes = [8, 8, 4], strides = [1, 1, 1]} : vector<10x10x4xf32> to vector<8x8x4xf32>
    %21 = vector.extract_strided_slice %13 {offsets = [2, 0, 0], sizes = [8, 8, 4], strides = [1, 1, 1]} : vector<10x10x4xf32> to vector<8x8x4xf32>
    %22 = vector.extract_strided_slice %13 {offsets = [2, 1, 0], sizes = [8, 8, 4], strides = [1, 1, 1]} : vector<10x10x4xf32> to vector<8x8x4xf32>
    %23 = vector.extract_strided_slice %13 {offsets = [2, 2, 0], sizes = [8, 8, 4], strides = [1, 1, 1]} : vector<10x10x4xf32> to vector<8x8x4xf32>
    %24 = tpu.concatenate %15, %16, %17, %18, %19, %20, %21, %22, %23 in 2 : vector<8x8x4xf32>, vector<8x8x4xf32>, vector<8x8x4xf32>, vector<8x8x4xf32>, vector<8x8x4xf32>, vector<8x8x4xf32>, vector<8x8x4xf32>, vector<8x8x4xf32>, vector<8x8x4xf32> -> vector<8x8x36xf32>
    %25 = vector.shape_cast %24 : vector<8x8x36xf32> to vector<64x36xf32>
    %cst_24 = arith.constant dense<0.000000e+00> : vector<64x128xf32>
    %26 = tpu.matmul %25, %14, %cst_24 {dimension_numbers = #tpu.dot_dimension_numbers<[1], [0], [0], [1], [0, 0, 1, 1], [], []>} : vector<64x36xf32>, vector<36x128xf32>, vector<64x128xf32> -> vector<64x128xf32>
    %c0_25 = arith.constant 0 : index
    %c0_26 = arith.constant 0 : index
    %27 = vector.load %arg3[%c0_25, %c0_26] : memref<1x128xf32, #tpu.memory_space<vmem>>, vector<1x128xf32>
    %28 = vector.broadcast %27 : vector<1x128xf32> to vector<64x128xf32>
    %29 = arith.addf %26, %28 : vector<64x128xf32>
    %cst_27 = arith.constant 0.00999999977 : f32
    %30 = vector.broadcast %cst_27 : f32 to vector<64x128xf32>
    %31 = arith.mulf %30, %29 : vector<64x128xf32>
    %32 = arith.maximumf %29, %31 : vector<64x128xf32>
    %cst_28 = arith.constant 0.000000e+00 : f32
    %33 = vector.broadcast %cst_28 : f32 to vector<1x10x128xf32>
    %cst_29 = arith.constant 0.000000e+00 : f32
    %34 = vector.broadcast %cst_29 : f32 to vector<10x1x128xf32>
    %c0_30 = arith.constant 0 : index
    %c0_31 = arith.constant 0 : index
    %c0_32 = arith.constant 0 : index
    %35 = vector.load %arg8[%c0_30, %c0_31, %c0_32] : memref<10x10x128xf32, #tpu.memory_space<vmem>>, vector<1x10x128xf32>
    tpu.vector_store %arg8[%c0_30, %c0_31, %c0_32], %33 {strides = array<i32>} : memref<10x10x128xf32, #tpu.memory_space<vmem>>, vector<1x10x128xf32>,
    %c9_33 = arith.constant 9 : index
    %c0_34 = arith.constant 0 : index
    %c0_35 = arith.constant 0 : index
    %36 = vector.load %arg8[%c9_33, %c0_34, %c0_35] : memref<10x10x128xf32, #tpu.memory_space<vmem>>, vector<1x10x128xf32>
    tpu.vector_store %arg8[%c9_33, %c0_34, %c0_35], %33 {strides = array<i32>} : memref<10x10x128xf32, #tpu.memory_space<vmem>>, vector<1x10x128xf32>,
    %c0_36 = arith.constant 0 : index
    %c0_37 = arith.constant 0 : index
    %c0_38 = arith.constant 0 : index
    %37 = vector.load %arg8[%c0_36, %c0_37, %c0_38] : memref<10x10x128xf32, #tpu.memory_space<vmem>>, vector<10x1x128xf32>
    tpu.vector_store %arg8[%c0_36, %c0_37, %c0_38], %34 {strides = array<i32>} : memref<10x10x128xf32, #tpu.memory_space<vmem>>, vector<10x1x128xf32>,
    %c0_39 = arith.constant 0 : index
    %c9_40 = arith.constant 9 : index
    %c0_41 = arith.constant 0 : index
    %38 = vector.load %arg8[%c0_39, %c9_40, %c0_41] : memref<10x10x128xf32, #tpu.memory_space<vmem>>, vector<10x1x128xf32>
    tpu.vector_store %arg8[%c0_39, %c9_40, %c0_41], %34 {strides = array<i32>} : memref<10x10x128xf32, #tpu.memory_space<vmem>>, vector<10x1x128xf32>,
    %39 = vector.shape_cast %32 : vector<64x128xf32> to vector<8x8x128xf32>
    %c1_42 = arith.constant 1 : index
    %c1_43 = arith.constant 1 : index
    %c0_44 = arith.constant 0 : index
    %40 = vector.load %arg8[%c1_42, %c1_43, %c0_44] : memref<10x10x128xf32, #tpu.memory_space<vmem>>, vector<8x8x128xf32>
    tpu.vector_store %arg8[%c1_42, %c1_43, %c0_44], %39 {strides = array<i32>} : memref<10x10x128xf32, #tpu.memory_space<vmem>>, vector<8x8x128xf32>,
    %c0_45 = arith.constant 0 : index
    %c0_46 = arith.constant 0 : index
    %c0_47 = arith.constant 0 : index
    %41 = vector.load %arg8[%c0_45, %c0_46, %c0_47] : memref<10x10x128xf32, #tpu.memory_space<vmem>>, vector<10x10x128xf32>
    %c0_48 = arith.constant 0 : index
    %c0_49 = arith.constant 0 : index
    %42 = vector.load %arg4[%c0_48, %c0_49] : memref<1152x128xf32, #tpu.memory_space<vmem>>, vector<1152x128xf32>
    %cst_50 = arith.constant 0.000000e+00 : f32
    %43 = vector.broadcast %cst_50 : f32 to vector<64x128xf32>
    %44 = vector.extract_strided_slice %41 {offsets = [0, 0, 0], sizes = [8, 8, 128], strides = [1, 1, 1]} : vector<10x10x128xf32> to vector<8x8x128xf32>
    %45 = vector.shape_cast %44 : vector<8x8x128xf32> to vector<64x128xf32>
    %46 = vector.extract_strided_slice %42 {offsets = [0, 0], sizes = [128, 128], strides = [1, 1]} : vector<1152x128xf32> to vector<128x128xf32>
    %cst_51 = arith.constant dense<0.000000e+00> : vector<64x128xf32>
    %47 = tpu.matmul %45, %46, %cst_51 {dimension_numbers = #tpu.dot_dimension_numbers<[1], [0], [0], [1], [0, 0, 1, 1], [], []>} : vector<64x128xf32>, vector<128x128xf32>, vector<64x128xf32> -> vector<64x128xf32>
    %48 = arith.addf %43, %47 : vector<64x128xf32>
    %49 = vector.extract_strided_slice %41 {offsets = [0, 1, 0], sizes = [8, 8, 128], strides = [1, 1, 1]} : vector<10x10x128xf32> to vector<8x8x128xf32>
    %50 = vector.shape_cast %49 : vector<8x8x128xf32> to vector<64x128xf32>
    %51 = vector.extract_strided_slice %42 {offsets = [128, 0], sizes = [128, 128], strides = [1, 1]} : vector<1152x128xf32> to vector<128x128xf32>
    %cst_52 = arith.constant dense<0.000000e+00> : vector<64x128xf32>
    %52 = tpu.matmul %50, %51, %cst_52 {dimension_numbers = #tpu.dot_dimension_numbers<[1], [0], [0], [1], [0, 0, 1, 1], [], []>} : vector<64x128xf32>, vector<128x128xf32>, vector<64x128xf32> -> vector<64x128xf32>
    %53 = arith.addf %48, %52 : vector<64x128xf32>
    %54 = vector.extract_strided_slice %41 {offsets = [0, 2, 0], sizes = [8, 8, 128], strides = [1, 1, 1]} : vector<10x10x128xf32> to vector<8x8x128xf32>
    %55 = vector.shape_cast %54 : vector<8x8x128xf32> to vector<64x128xf32>
    %56 = vector.extract_strided_slice %42 {offsets = [256, 0], sizes = [128, 128], strides = [1, 1]} : vector<1152x128xf32> to vector<128x128xf32>
    %cst_53 = arith.constant dense<0.000000e+00> : vector<64x128xf32>
    %57 = tpu.matmul %55, %56, %cst_53 {dimension_numbers = #tpu.dot_dimension_numbers<[1], [0], [0], [1], [0, 0, 1, 1], [], []>} : vector<64x128xf32>, vector<128x128xf32>, vector<64x128xf32> -> vector<64x128xf32>
    %58 = arith.addf %53, %57 : vector<64x128xf32>
    %59 = vector.extract_strided_slice %41 {offsets = [1, 0, 0], sizes = [8, 8, 128], strides = [1, 1, 1]} : vector<10x10x128xf32> to vector<8x8x128xf32>
    %60 = vector.shape_cast %59 : vector<8x8x128xf32> to vector<64x128xf32>
    %61 = vector.extract_strided_slice %42 {offsets = [384, 0], sizes = [128, 128], strides = [1, 1]} : vector<1152x128xf32> to vector<128x128xf32>
    %cst_54 = arith.constant dense<0.000000e+00> : vector<64x128xf32>
    %62 = tpu.matmul %60, %61, %cst_54 {dimension_numbers = #tpu.dot_dimension_numbers<[1], [0], [0], [1], [0, 0, 1, 1], [], []>} : vector<64x128xf32>, vector<128x128xf32>, vector<64x128xf32> -> vector<64x128xf32>
    %63 = arith.addf %58, %62 : vector<64x128xf32>
    %64 = vector.extract_strided_slice %41 {offsets = [1, 1, 0], sizes = [8, 8, 128], strides = [1, 1, 1]} : vector<10x10x128xf32> to vector<8x8x128xf32>
    %65 = vector.shape_cast %64 : vector<8x8x128xf32> to vector<64x128xf32>
    %66 = vector.extract_strided_slice %42 {offsets = [512, 0], sizes = [128, 128], strides = [1, 1]} : vector<1152x128xf32> to vector<128x128xf32>
    %cst_55 = arith.constant dense<0.000000e+00> : vector<64x128xf32>
    %67 = tpu.matmul %65, %66, %cst_55 {dimension_numbers = #tpu.dot_dimension_numbers<[1], [0], [0], [1], [0, 0, 1, 1], [], []>} : vector<64x128xf32>, vector<128x128xf32>, vector<64x128xf32> -> vector<64x128xf32>
    %68 = arith.addf %63, %67 : vector<64x128xf32>
    %69 = vector.extract_strided_slice %41 {offsets = [1, 2, 0], sizes = [8, 8, 128], strides = [1, 1, 1]} : vector<10x10x128xf32> to vector<8x8x128xf32>
    %70 = vector.shape_cast %69 : vector<8x8x128xf32> to vector<64x128xf32>
    %71 = vector.extract_strided_slice %42 {offsets = [640, 0], sizes = [128, 128], strides = [1, 1]} : vector<1152x128xf32> to vector<128x128xf32>
    %cst_56 = arith.constant dense<0.000000e+00> : vector<64x128xf32>
    %72 = tpu.matmul %70, %71, %cst_56 {dimension_numbers = #tpu.dot_dimension_numbers<[1], [0], [0], [1], [0, 0, 1, 1], [], []>} : vector<64x128xf32>, vector<128x128xf32>, vector<64x128xf32> -> vector<64x128xf32>
    %73 = arith.addf %68, %72 : vector<64x128xf32>
    %74 = vector.extract_strided_slice %41 {offsets = [2, 0, 0], sizes = [8, 8, 128], strides = [1, 1, 1]} : vector<10x10x128xf32> to vector<8x8x128xf32>
    %75 = vector.shape_cast %74 : vector<8x8x128xf32> to vector<64x128xf32>
    %76 = vector.extract_strided_slice %42 {offsets = [768, 0], sizes = [128, 128], strides = [1, 1]} : vector<1152x128xf32> to vector<128x128xf32>
    %cst_57 = arith.constant dense<0.000000e+00> : vector<64x128xf32>
    %77 = tpu.matmul %75, %76, %cst_57 {dimension_numbers = #tpu.dot_dimension_numbers<[1], [0], [0], [1], [0, 0, 1, 1], [], []>} : vector<64x128xf32>, vector<128x128xf32>, vector<64x128xf32> -> vector<64x128xf32>
    %78 = arith.addf %73, %77 : vector<64x128xf32>
    %79 = vector.extract_strided_slice %41 {offsets = [2, 1, 0], sizes = [8, 8, 128], strides = [1, 1, 1]} : vector<10x10x128xf32> to vector<8x8x128xf32>
    %80 = vector.shape_cast %79 : vector<8x8x128xf32> to vector<64x128xf32>
    %81 = vector.extract_strided_slice %42 {offsets = [896, 0], sizes = [128, 128], strides = [1, 1]} : vector<1152x128xf32> to vector<128x128xf32>
    %cst_58 = arith.constant dense<0.000000e+00> : vector<64x128xf32>
    %82 = tpu.matmul %80, %81, %cst_58 {dimension_numbers = #tpu.dot_dimension_numbers<[1], [0], [0], [1], [0, 0, 1, 1], [], []>} : vector<64x128xf32>, vector<128x128xf32>, vector<64x128xf32> -> vector<64x128xf32>
    %83 = arith.addf %78, %82 : vector<64x128xf32>
    %84 = vector.extract_strided_slice %41 {offsets = [2, 2, 0], sizes = [8, 8, 128], strides = [1, 1, 1]} : vector<10x10x128xf32> to vector<8x8x128xf32>
    %85 = vector.shape_cast %84 : vector<8x8x128xf32> to vector<64x128xf32>
    %86 = vector.extract_strided_slice %42 {offsets = [1024, 0], sizes = [128, 128], strides = [1, 1]} : vector<1152x128xf32> to vector<128x128xf32>
    %cst_59 = arith.constant dense<0.000000e+00> : vector<64x128xf32>
    %87 = tpu.matmul %85, %86, %cst_59 {dimension_numbers = #tpu.dot_dimension_numbers<[1], [0], [0], [1], [0, 0, 1, 1], [], []>} : vector<64x128xf32>, vector<128x128xf32>, vector<64x128xf32> -> vector<64x128xf32>
    %88 = arith.addf %83, %87 : vector<64x128xf32>
    %c0_60 = arith.constant 0 : index
    %c0_61 = arith.constant 0 : index
    %89 = vector.load %arg5[%c0_60, %c0_61] : memref<1x128xf32, #tpu.memory_space<vmem>>, vector<1x128xf32>
    %90 = vector.broadcast %89 : vector<1x128xf32> to vector<64x128xf32>
    %91 = arith.addf %88, %90 : vector<64x128xf32>
    %cst_62 = arith.constant 0.00999999977 : f32
    %92 = vector.broadcast %cst_62 : f32 to vector<64x128xf32>
    %93 = arith.mulf %92, %91 : vector<64x128xf32>
    %94 = arith.maximumf %91, %93 : vector<64x128xf32>
    %95 = arith.addf %94, %32 : vector<64x128xf32>
    %c0_63 = arith.constant 0 : index
    %c0_64 = arith.constant 0 : index
    %c0_65 = arith.constant 0 : index
    %96 = vector.load %arg6[%c0_63, %c0_64, %c0_65] : memref<1x64x128xf32, #tpu.memory_space<vmem>>, vector<1x64x128xf32>
    %97 = vector.shape_cast %96 : vector<1x64x128xf32> to vector<64x128xf32>
    %98 = vector.shape_cast %95 : vector<64x128xf32> to vector<1x64x128xf32>
    tpu.vector_store %arg6[%c0_63, %c0_64, %c0_65], %98 {strides = array<i32>} : memref<1x64x128xf32, #tpu.memory_space<vmem>>, vector<1x64x128xf32>,
    return
  }
  func.func @transform_0(%arg0: i32) -> (i32, i32, i32, i32) {
    %c0_i32 = arith.constant 0 : i32
    %c0_i32_0 = arith.constant 0 : i32
    %c0_i32_1 = arith.constant 0 : i32
    %c0_i32_2 = arith.constant 0 : i32
    return %arg0, %c0_i32, %c0_i32_0, %c0_i32_1 : i32, i32, i32, i32
  }
  func.func @transform_1(%arg0: i32) -> (i32, i32) {
    %c0_i32 = arith.constant 0 : i32
    %c0_i32_0 = arith.constant 0 : i32
    %c0_i32_1 = arith.constant 0 : i32
    return %c0_i32, %c0_i32_0 : i32, i32
  }
  func.func @transform_2(%arg0: i32) -> (i32, i32) {
    %c0_i32 = arith.constant 0 : i32
    %c0_i32_0 = arith.constant 0 : i32
    %c0_i32_1 = arith.constant 0 : i32
    return %c0_i32, %c0_i32_0 : i32, i32
  }
  func.func @transform_3(%arg0: i32) -> (i32, i32) {
    %c0_i32 = arith.constant 0 : i32
    %c0_i32_0 = arith.constant 0 : i32
    %c0_i32_1 = arith.constant 0 : i32
    return %c0_i32, %c0_i32_0 : i32, i32
  }
  func.func @transform_4(%arg0: i32) -> (i32, i32) {
    %c0_i32 = arith.constant 0 : i32
    %c0_i32_0 = arith.constant 0 : i32
    %c0_i32_1 = arith.constant 0 : i32
    return %c0_i32, %c0_i32_0 : i32, i32
  }
  func.func @transform_5(%arg0: i32) -> (i32, i32, i32) {
    %c0_i32 = arith.constant 0 : i32
    %c0_i32_0 = arith.constant 0 : i32
    %c0_i32_1 = arith.constant 0 : i32
    return %arg0, %c0_i32, %c0_i32_0 : i32, i32, i32
  }
}

</mosaic_0001>

<bundles_post_ra>
// kernel: tpu_custom_call.1
= control target key start
LH: loop header
LB: loop body
LE: loop exit
PB: predicated region body
PF: predicated region fallthrough
CT: control target
= control target key end

     0   :  { %10 = vsyncpa [#allocation5], 0  ;;  %s3686_s0 = inlined_call_operand.vmem [shape: f32[2,16,16,4], index: 0, kind: input, shape index: {}]   ;;  %s3687_s1 = inlined_call_operand.vmem [shape: f32[36,128], index: 1, kind: input, shape index: {}]   ;;  %s3688_s2 = inlined_call_operand.vmem [shape: f32[1,128], index: 2, kind: input, shape index: {}]   ;;  %s3689_s3 = inlined_call_operand.hbm [shape: f32[1152,128], index: 3, kind: input, shape index: {}]   ;;  %s3690_s4 = inlined_call_operand.vmem [shape: f32[1,128], index: 4, kind: input, shape index: {}]   ;;  %s3691_s5 = inlined_call_operand.hbm [shape: f32[2,64,128], index: 5, kind: output, shape index: {}]  }
   0x1   :  { %11 = vsyncpa [#allocation6], 0 }
   0x2   :  { %13 = vsyncpa [#allocation6 + $0x1], 0  ;;  %s2640_s18 = smov 0   ;;  %s2642_s19 = smov 0  }
   0x3   :  { %s2644_s20 = smov 0   ;;  %s2646_s21 = smov 0  }
   0x4 LB: > { %s2661_s22 = sadd.s32 4294967295, %s2595_s21   ;;  %s2369_s23 = sadd.s32 4294967294, %s2595_s21   ;;  %s2595_s21 = sphi %s2646_s21, %s3703_s21   ;;  %s2591_s20 = sphi %s2644_s20, %s3702_s20   ;;  %s2587_s19 = sphi %s2642_s19, %s3701_s19   ;;  %s2583_s18 = sphi %s2640_s18, %s3700_s18  }
   0x5   : > { %s2665_s24 = sadd.s32 1, %s2595_s21   ;;  %s136_s25 = sadd.s32 1, %s2591_s20 }
   0x6   : > { %s133_s26 = ssub.s32 %s2595_s21, %s2665_s24  ;;  %p146_p0 = scmp.ne.s32.totalorder %s2591_s20, %s2587_s19 }
   0x7   : > { %p134_p1 = scmp.eq.s32.totalorder %s133_s26, 0  ;;  %p147_p2 = scmp.eq.s32.totalorder %s2661_s22, 1 }
   0x8   : > { %p152_p3 = scmp.ne.s32.totalorder %s2587_s19, %s2583_s18  ;;  %p153_p4 = scmp.eq.s32.totalorder %s2369_s23, 1 }
   0x9   : > { %s2676_s27 = scalar_select %p134_p1, %s2591_s20, %s136_s25  }
   0xa   : > { %p2678_p5 = por %p147_p2, %p146_p0  ;;  %p2682_p6 = por %p153_p4, %p152_p3 }
   0xb   : > { %p2370_p7 = scmp.ge.s32.totalorder %s2595_s21, 1  ;;  %p160_p8 = scmp.lt.s32.totalorder %s2595_s21, 3 }
   0xc   : > { %p2445_p9 = scmp.eq.s32.totalorder %s2661_s22, 0  ;;  %s177_s7 = sshll.u32 %s3689_s3, 4  ;;  %s178_s7 = int_to_ptr.hbm [resolvable:$true] %s177_s7 }
   0xd   : > { %p161_p10 = pnand %p2370_p7, %p160_p8  ;;  %s2597_s8 = smov [#allocation4]  }
   0xe   : > { %s179_s9 = sshll.u32 %s2597_s8, 4  ;;  %s2598_s10 = smov 128   ;;  %s180_s9 = int_to_ptr.vmem [resolvable:$true] %s179_s9 }
   0xf   : > { %p2437_p11 = pneg %p161_p10  ;;  %s2599_s11 = smov 8  }
  0x10   : > { %206 = sbr.rel (%p161_p10) target bundleno = 782 (0x30e), region = 40 }
  0x11   : > { %p2438_p12 = pnand %p2445_p9, %p2437_p11 }
  0x13   : > { %2440 = dma.hbm_to_vmem [thread:$0]  (!%p2438_p12), %s178_s7, 18432, %s180_s9, [#allocation5], %s2598_s10, %s2598_s10, %s2599_s11  }
  0x15   : > { %2574 = dma.done.wait (%p2445_p9), [#allocation5], 18432  }
  0x16   : > { %2576 = vsyncadd (%p2445_p9), [#allocation5], 4294948864  ;;  %vm272_vm0 = vcmask 31744   ;;  %vm887_vm1 = vcmask 24576   ;;  %vm433_vm2 = vcmask 25600   ;;  %v2600_v0 = vmov 0.0  }
  0x17   : > { %882 = vst.msk [vmem:[#allocation2] sm:$0xff] %vm272_vm0, %v2600_v0  ;;  %p235_p13 = scmp.lt.s32.totalorder %s2661_s22, 1  ;;  %vm1093_vm3 = vcmask 1046528   ;;  %vm1142_vm4 = vcmask 1045504   ;;  %s2601_s17 = smov 4   ;;  %vm972_vm5 = vcmask 1041409  }
  0x18   : > { %883 = vst.msk [vmem:[#allocation2 + $0x8] sm:$0x3] %vm433_vm2, %v2600_v0  ;;  %vm974_vm6 = vcmask 1042434   ;;  %vm976_vm7 = vcmask 1043459   ;;  %vm978_vm8 = vcmask 1044484   ;;  %vm980_vm9 = vcmask 1045509  }
  0x19   : > { %888 = vst.msk [vmem:[#allocation2] sm:$0x1] %vm887_vm1, %v2600_v0  ;;  %s236_s12 = scalar_select %p235_p13, %s2661_s22, 1  ;;  %vm982_vm10 = vcmask 1046534   ;;  %vm984_vm11 = vcmask 1047559   ;;  %vm1451_vm12 = vcmask 1043456  }
  0x1a   : > { %898 = vst.msk [vmem:[#allocation2 + $0x9] sm:$0x1] %vm887_vm1, %v2600_v0  ;;  %s2602_s23 = smov 8   ;;  %s2603_s25 = smov 12   ;;  %vm1359_vm13 = vcmask 64512   ;;  %vm1368_vm14 = vcmask 97280  }
  0x1b   : > { %885 = vst.msk [vmem:[#allocation2 + $0x90] sm:$0xff] %vm272_vm0, %v2600_v0  ;;  %s2392_s13 = sshll.u32 %s236_s12, 8  ;;  %s2604_s26 = smov 24   ;;  %vm1377_vm15 = vcmask 130048  }
  0x1c   : > { %886 = vst.msk [vmem:[#allocation2 + $0x98] sm:$0x3] %vm433_vm2, %v2600_v0  ;;  %s2717_s16 = scalar_lea.vmem %s3686_s0, %s2392_s13  ;;  %s2605_s30 = smov 28  }
  0x1d   : > { %889 = vst.msk [vmem:[#allocation2 + $0x10] sm:$0x1] %vm887_vm1, %v2600_v0  ;;  %v240_v1 = vld [vmem:[%s2717_s16] sm:$0xff]  ;;  %v241_v2 = vld [vmem:[%s2717_s16 + $0x8] sm:$0xff]  ;;  %v242_v3 = vld [vmem:[%s2717_s16 + $0x10] sm:$0xff]  ;;  %s2606_s6 = smov 20  }
  0x1e   : > { %890 = vst.msk [vmem:[#allocation2 + $0x20] sm:$0x1] %vm887_vm1, %v2600_v0  ;;  %v243_v4 = vld [vmem:[%s2717_s16 + $0x18] sm:$0xff]  ;;  %v273_v5 = vsel %vm272_vm0, %v240_v1, -inf  ;;  %v274_v6 = vsel %vm272_vm0, %v242_v3, -inf  ;;  %v276_v7 = vsel %vm272_vm0, %v241_v2, -inf }
  0x1f   : > { %891 = vst.msk [vmem:[#allocation2 + $0x30] sm:$0x1] %vm887_vm1, %v2600_v0  ;;  %v275_v9 = vmax.f32 %v273_v5, %v274_v6  ;;  %v277_v10 = vsel %vm272_vm0, %v243_v4, -inf  ;;  %v244_v63 = vld [vmem:[%s2717_s16 + $0x20] sm:$0xff]  ;;  %s2607_s7 = smov 16   ;;  %s2608_s8 = smov 32  }
  0x20   : > { %v1052_v8 = vld [vmem:[#allocation2] sm:$0xff]  ;;  %892 = vst.msk [vmem:[#allocation2 + $0x40] sm:$0x1] %vm887_vm1, %v2600_v0  ;;  %v278_v14 = vmax.f32 %v276_v7, %v277_v10  ;;  %s2393_s11 = sshll.u32 %s2661_s22, 6 }
  0x21   : > { %v1053_v11 = vld [vmem:[#allocation2 + $0x8] sm:$0x3]  ;;  %v1094_v12 = vrot.slane %v1052_v8, 1  ;;  %893 = vst.msk [vmem:[#allocation2 + $0x50] sm:$0x1] %vm887_vm1, %v2600_v0  ;;  %v1143_v13 = vrot.slane %v1052_v8, 2  ;;  %s2291_s14 = scalar_lea.hbm %s3691_s5, %s2393_s11 }
  0x22   : > { %v1095_v15 = vrot.slane %v1053_v11, 1  ;;  %894 = vst.msk [vmem:[#allocation2 + $0x60] sm:$0x1] %vm887_vm1, %v2600_v0  ;;  %v1144_v16 = vrot.slane %v1053_v11, 2  ;;  %v337_v17 = vrot.slane %v275_v9, 2  ;;  %v338_v18 = vrot.slane %v275_v9, 4 }
  0x23   : > { %895 = vst.msk [vmem:[#allocation2 + $0x70] sm:$0x1] %vm887_vm1, %v2600_v0  ;;  %v339_v19 = vrot.slane %v275_v9, 6  ;;  %v340_v20 = vrot.slane %v278_v14, 2  ;;  %v341_v21 = vrot.slane %v278_v14, 4  ;;  %v342_v22 = vrot.slane %v278_v14, 6 }
  0x24   : > { %v1096_v23 = vsel %vm1093_vm3, %v1094_v12, %v1095_v15  ;;  %896 = vst.msk [vmem:[#allocation2 + $0x80] sm:$0x1] %vm887_vm1, %v2600_v0  ;;  %v1145_v24 = vsel %vm1142_vm4, %v1143_v13, %v1144_v16  ;;  %v434_v25 = vsel %vm433_vm2, %v275_v9, -inf  ;;  %v441_v26 = vsel %vm433_vm2, %v337_v17, -inf  ;;  %v246_v9 = vld [vmem:[%s2717_s16 + $0x30] sm:$0xff]  ;;  %v247_v15 = vld [vmem:[%s2717_s16 + $0x38] sm:$0xff] }
  0x25   : > { %1118 = vrot.lane.b32.xlu0 %v1096_v23, %s2601_s17  ;;  %899 = vst.msk [vmem:[#allocation2 + $0x19] sm:$0x1] %vm887_vm1, %v2600_v0  ;;  %v435_v27 = vrot.slane %v434_v25, 4  ;;  %v442_v28 = vrot.slane %v441_v26, 4  ;;  %v448_v29 = vsel %vm433_vm2, %v338_v18, -inf  ;;  %v455_v30 = vsel %vm433_vm2, %v339_v19, -inf }
  0x26   : > { %900 = vst.msk [vmem:[#allocation2 + $0x29] sm:$0x1] %vm887_vm1, %v2600_v0  ;;  %v449_v31 = vrot.slane %v448_v29, 4  ;;  %v456_v32 = vrot.slane %v455_v30, 4  ;;  %v462_v33 = vsel %vm433_vm2, %v278_v14, -inf  ;;  %v469_v34 = vsel %vm433_vm2, %v340_v20, -inf }
  0x27   : > { %901 = vst.msk [vmem:[#allocation2 + $0x39] sm:$0x1] %vm887_vm1, %v2600_v0  ;;  %v436_v35 = vmax.f32 %v434_v25, %v435_v27  ;;  %v443_v36 = vmax.f32 %v441_v26, %v442_v28  ;;  %v463_v37 = vrot.slane %v462_v33, 4  ;;  %v470_v38 = vrot.slane %v469_v34, 4  ;;  %v245_v14 = vld [vmem:[%s2717_s16 + $0x28] sm:$0xff] }
  0x28   : > { %902 = vst.msk [vmem:[#allocation2 + $0x49] sm:$0x1] %vm887_vm1, %v2600_v0  ;;  %v450_v39 = vmax.f32 %v448_v29, %v449_v31  ;;  %v457_v40 = vmax.f32 %v455_v30, %v456_v32  ;;  %v476_v41 = vsel %vm433_vm2, %v341_v21, -inf  ;;  %v483_v42 = vsel %vm433_vm2, %v342_v22, -inf }
  0x29   : > { %903 = vst.msk [vmem:[#allocation2 + $0x59] sm:$0x1] %vm887_vm1, %v2600_v0  ;;  %v437_v43 = vrot.slane %v436_v35, 2  ;;  %v444_v44 = vrot.slane %v443_v36, 2  ;;  %v464_v45 = vmax.f32 %v462_v33, %v463_v37  ;;  %v471_v46 = vmax.f32 %v469_v34, %v470_v38 }
  0x2a   : > { %904 = vst.msk [vmem:[#allocation2 + $0x69] sm:$0x1] %vm887_vm1, %v2600_v0  ;;  %v451_v47 = vrot.slane %v450_v39, 2  ;;  %v458_v48 = vrot.slane %v457_v40, 2  ;;  %v477_v49 = vrot.slane %v476_v41, 4  ;;  %v484_v50 = vrot.slane %v483_v42, 4 }
  0x2b   : > { %905 = vst.msk [vmem:[#allocation2 + $0x79] sm:$0x1] %vm887_vm1, %v2600_v0  ;;  %v438_v51 = vmax.f32 %v436_v35, %v437_v43  ;;  %v445_v52 = vmax.f32 %v443_v36, %v444_v44  ;;  %v465_v53 = vrot.slane %v464_v45, 2  ;;  %v472_v54 = vrot.slane %v471_v46, 2 }
  0x2c   : > { %906 = vst.msk [vmem:[#allocation2 + $0x89] sm:$0x1] %vm887_vm1, %v2600_v0  ;;  %v452_v55 = vmax.f32 %v450_v39, %v451_v47  ;;  %v459_v56 = vmax.f32 %v457_v40, %v458_v48  ;;  %v478_v57 = vmax.f32 %v476_v41, %v477_v49  ;;  %v485_v58 = vmax.f32 %v483_v42, %v484_v50 }
  0x2d   : > { %1512 = vst [vmem:[#allocation3] sm:$0xff] %v2600_v0  ;;  %1167 = vrot.lane.b32.xlu0 %v1145_v24, %s2602_s23  ;;  %v439_v59 = vrot.slane %v438_v51, 1  ;;  %v446_v60 = vrot.slane %v445_v52, 1  ;;  %v466_v61 = vmax.f32 %v464_v45, %v465_v53  ;;  %v473_v62 = vmax.f32 %v471_v46, %v472_v54 }
  0x2e   : > { %1513 = vst [vmem:[#allocation3 + $0x8] sm:$0x3] %v2600_v0  ;;  %v453_v1 = vrot.slane %v452_v55, 1  ;;  %v460_v2 = vrot.slane %v459_v56, 1  ;;  %v479_v3 = vrot.slane %v478_v57, 2  ;;  %v486_v4 = vrot.slane %v485_v58, 2 }
  0x2f   : > { %1515 = vst [vmem:[#allocation3 + $0x90] sm:$0xff] %v2600_v0  ;;  %v440_v5 = vmax.f32 %v438_v51, %v439_v59  ;;  %v447_v6 = vmax.f32 %v445_v52, %v446_v60  ;;  %v467_v7 = vrot.slane %v466_v61, 1  ;;  %v474_v8 = vrot.slane %v473_v62, 1 }
  0x30   : > { %1516 = vst [vmem:[#allocation3 + $0x98] sm:$0x3] %v2600_v0  ;;  %v454_v10 = vmax.f32 %v452_v55, %v453_v1  ;;  %v461_v11 = vmax.f32 %v459_v56, %v460_v2  ;;  %v480_v12 = vmax.f32 %v478_v57, %v479_v3  ;;  %v487_v13 = vmax.f32 %v485_v58, %v486_v4 }
  0x31   : > { %1518 = vst [vmem:[#allocation3 + $0x10] sm:$0x1] %v2600_v0  ;;  %v468_v16 = vmax.f32 %v466_v61, %v467_v7  ;;  %v475_v17 = vmax.f32 %v473_v62, %v474_v8  ;;  %v973_v18 = vsel %vm972_vm5, %v447_v6, %v440_v5  ;;  %v279_v19 = vsel %vm272_vm0, %v244_v63, -inf }
  0x32   : > { %1519 = vst [vmem:[#allocation3 + $0x20] sm:$0x1] %v2600_v0  ;;  %v481_v20 = vrot.slane %v480_v12, 1  ;;  %v488_v21 = vrot.slane %v487_v13, 1  ;;  %v975_v22 = vsel %vm974_vm6, %v454_v10, %v973_v18  ;;  %v280_v23 = vsel %vm272_vm0, %v246_v9, -inf }
  0x33   : > { %1520 = vst [vmem:[#allocation3 + $0x30] sm:$0x1] %v2600_v0  ;;  %v977_v24 = vsel %vm976_vm7, %v461_v11, %v975_v22  ;;  %v281_v25 = vmax.f32 %v279_v19, %v280_v23  ;;  %v282_v26 = vsel %vm272_vm0, %v245_v14, -inf  ;;  %v283_v27 = vsel %vm272_vm0, %v247_v15, -inf  ;;  %v250_v22 = vld [vmem:[%s2717_s16 + $0x50] sm:$0xff] }
  0x34   : > { %1521 = vst [vmem:[#allocation3 + $0x40] sm:$0x1] %v2600_v0  ;;  %v482_v28 = vmax.f32 %v480_v12, %v481_v20  ;;  %v489_v29 = vmax.f32 %v487_v13, %v488_v21  ;;  %v979_v30 = vsel %vm978_vm8, %v468_v16, %v977_v24  ;;  %v284_v31 = vmax.f32 %v282_v26, %v283_v27  ;;  %v248_v21 = vld [vmem:[%s2717_s16 + $0x40] sm:$0xff] }
  0x35   : > { %1522 = vst [vmem:[#allocation3 + $0x50] sm:$0x1] %v2600_v0  ;;  %v981_v32 = vsel %vm980_vm9, %v475_v17, %v979_v30  ;;  %v343_v33 = vrot.slane %v281_v25, 2  ;;  %v344_v34 = vrot.slane %v281_v25, 4  ;;  %v345_v35 = vrot.slane %v281_v25, 6 }
  0x36   : > { %1523 = vst [vmem:[#allocation3 + $0x60] sm:$0x1] %v2600_v0  ;;  %v983_v36 = vsel %vm982_vm10, %v482_v28, %v981_v32  ;;  %v346_v37 = vrot.slane %v284_v31, 2  ;;  %v347_v38 = vrot.slane %v284_v31, 4  ;;  %v348_v39 = vrot.slane %v284_v31, 6  ;;  %v251_v32 = vld [vmem:[%s2717_s16 + $0x58] sm:$0xff] }
  0x37   : > { %1524 = vst [vmem:[#allocation3 + $0x70] sm:$0x1] %v2600_v0  ;;  %v2795_v40 = vsel %vm984_vm11, %v489_v29, %v983_v36  ;;  %v490_v41 = vsel %vm433_vm2, %v281_v25, -inf  ;;  %v497_v42 = vsel %vm433_vm2, %v343_v33, -inf  ;;  %v504_v43 = vsel %vm433_vm2, %v344_v34, -inf }
  0x38   : > { %1525 = vst [vmem:[#allocation3 + $0x80] sm:$0x1] %v2600_v0  ;;  %v491_v44 = vrot.slane %v490_v41, 4  ;;  %v498_v45 = vrot.slane %v497_v42, 4  ;;  %v505_v46 = vrot.slane %v504_v43, 4  ;;  %v511_v47 = vsel %vm433_vm2, %v345_v35, -inf }
  0x39   : > { %1528 = vst [vmem:[#allocation3 + $0x19] sm:$0x1] %v2600_v0  ;;  %v512_v48 = vrot.slane %v511_v47, 4  ;;  %v518_v49 = vsel %vm433_vm2, %v284_v31, -inf  ;;  %v525_v50 = vsel %vm433_vm2, %v346_v37, -inf  ;;  %v532_v51 = vsel %vm433_vm2, %v347_v38, -inf }
  0x3a   : > { %1529 = vst [vmem:[#allocation3 + $0x29] sm:$0x1] %v2600_v0  ;;  %v492_v52 = vmax.f32 %v490_v41, %v491_v44  ;;  %v499_v53 = vmax.f32 %v497_v42, %v498_v45  ;;  %v506_v54 = vmax.f32 %v504_v43, %v505_v46  ;;  %v519_v55 = vrot.slane %v518_v49, 4  ;;  %v249_v31 = vld [vmem:[%s2717_s16 + $0x48] sm:$0xff] }
  0x3b   : > { %1530 = vst [vmem:[#allocation3 + $0x39] sm:$0x1] %v2600_v0  ;;  %v513_v56 = vmax.f32 %v511_v47, %v512_v48  ;;  %v526_v57 = vrot.slane %v525_v50, 4  ;;  %v533_v58 = vrot.slane %v532_v51, 4  ;;  %v539_v59 = vsel %vm433_vm2, %v348_v39, -inf }
  0x3c   : > { %1531 = vst [vmem:[#allocation3 + $0x49] sm:$0x1] %v2600_v0  ;;  %v493_v60 = vrot.slane %v492_v52, 2  ;;  %v500_v61 = vrot.slane %v499_v53, 2  ;;  %v507_v62 = vrot.slane %v506_v54, 2  ;;  %v520_v63 = vmax.f32 %v518_v49, %v519_v55 }
  0x3d   : > { %1532 = vst [vmem:[#allocation3 + $0x59] sm:$0x1] %v2600_v0  ;;  %v514_v1 = vrot.slane %v513_v56, 2  ;;  %v527_v2 = vmax.f32 %v525_v50, %v526_v57  ;;  %v534_v3 = vmax.f32 %v532_v51, %v533_v58  ;;  %v540_v4 = vrot.slane %v539_v59, 4 }
  0x3e   : > { %1533 = vst [vmem:[#allocation3 + $0x69] sm:$0x1] %v2600_v0  ;;  %v494_v5 = vmax.f32 %v492_v52, %v493_v60  ;;  %v501_v6 = vmax.f32 %v499_v53, %v500_v61  ;;  %v508_v7 = vmax.f32 %v506_v54, %v507_v62  ;;  %v521_v8 = vrot.slane %v520_v63, 2 }
  0x3f   : > { %1534 = vst [vmem:[#allocation3 + $0x79] sm:$0x1] %v2600_v0  ;;  %v515_v9 = vmax.f32 %v513_v56, %v514_v1  ;;  %v528_v10 = vrot.slane %v527_v2, 2  ;;  %v535_v11 = vrot.slane %v534_v3, 2  ;;  %v541_v12 = vmax.f32 %v539_v59, %v540_v4 }
  0x40   : > { %1535 = vst [vmem:[#allocation3 + $0x89] sm:$0x1] %v2600_v0  ;;  %v495_v13 = vrot.slane %v494_v5, 1  ;;  %v502_v14 = vrot.slane %v501_v6, 1  ;;  %v509_v15 = vrot.slane %v508_v7, 1  ;;  %v522_v16 = vmax.f32 %v520_v63, %v521_v8  ;;  %v252_v63 = vld [vmem:[%s2717_s16 + $0x60] sm:$0xff] }
  0x41   : > { %897 = vst.msk [vmem:[#allocation2 + $0x90] sm:$0x1] %vm887_vm1, %v2600_v0  ;;  %v516_v17 = vrot.slane %v515_v9, 1  ;;  %v529_v18 = vmax.f32 %v527_v2, %v528_v10  ;;  %v536_v19 = vmax.f32 %v534_v3, %v535_v11  ;;  %v542_v20 = vrot.slane %v541_v12, 2 }
  0x42   : > { %907 = vst.msk [vmem:[#allocation2 + $0x99] sm:$0x1] %vm887_vm1, %v2600_v0  ;;  %v496_v23 = vmax.f32 %v494_v5, %v495_v13  ;;  %v503_v24 = vmax.f32 %v501_v6, %v502_v14  ;;  %v510_v25 = vmax.f32 %v508_v7, %v509_v15  ;;  %v523_v26 = vrot.slane %v522_v16, 1 }
  0x43   : > { %1517 = vst [vmem:[#allocation3] sm:$0x1] %v2600_v0  ;;  %v517_v27 = vmax.f32 %v515_v9, %v516_v17  ;;  %v530_v28 = vrot.slane %v529_v18, 1  ;;  %v537_v29 = vrot.slane %v536_v19, 1  ;;  %v543_v30 = vmax.f32 %v541_v12, %v542_v20 }
  0x44   : > { %1526 = vst [vmem:[#allocation3 + $0x90] sm:$0x1] %v2600_v0  ;;  %v524_v33 = vmax.f32 %v522_v16, %v523_v26  ;;  %v986_v34 = vsel %vm972_vm5, %v503_v24, %v496_v23  ;;  %v285_v35 = vsel %vm272_vm0, %v248_v21, -inf  ;;  %v286_v36 = vsel %vm272_vm0, %v250_v22, -inf }
  0x45   : > { %1527 = vst [vmem:[#allocation3 + $0x9] sm:$0x1] %v2600_v0  ;;  %v531_v37 = vmax.f32 %v529_v18, %v530_v28  ;;  %v538_v38 = vmax.f32 %v536_v19, %v537_v29  ;;  %v544_v39 = vrot.slane %v543_v30, 1  ;;  %v987_v41 = vsel %vm974_vm6, %v510_v25, %v986_v34 }
  0x46   : > { %1536 = vst [vmem:[#allocation3 + $0x99] sm:$0x1] %v2600_v0  ;;  %v988_v42 = vsel %vm976_vm7, %v517_v27, %v987_v41  ;;  %v287_v43 = vmax.f32 %v285_v35, %v286_v36  ;;  %v288_v44 = vsel %vm272_vm0, %v249_v31, -inf  ;;  %v289_v45 = vsel %vm272_vm0, %v251_v32, -inf }
  0x47   : > { %1044 = vst.msk [vmem:[#allocation2 + $0x11] sm:$0xff] %vm272_vm0, %v2795_v40  ;;  %v545_v46 = vmax.f32 %v543_v30, %v544_v39  ;;  %v989_v47 = vsel %vm978_vm8, %v524_v33, %v988_v42  ;;  %v290_v48 = vmax.f32 %v288_v44, %v289_v45  ;;  %v2853_v14 = vsel %vm272_vm0, %v252_v63, -inf }
  0x48   : > { %v990_v49 = vsel %vm980_vm9, %v531_v37, %v989_v47  ;;  %v349_v50 = vrot.slane %v287_v43, 2  ;;  %v350_v51 = vrot.slane %v287_v43, 4  ;;  %v351_v0 = vrot.slane %v287_v43, 6 }
  0x49   : > { %v991_v52 = vsel %vm982_vm10, %v538_v38, %v990_v49  ;;  %v352_v53 = vrot.slane %v290_v48, 2  ;;  %v353_v54 = vrot.slane %v290_v48, 4  ;;  %v354_v55 = vrot.slane %v290_v48, 6 }
  0x4a   : > { %v992_v56 = vsel %vm984_vm11, %v545_v46, %v991_v52  ;;  %v546_v57 = vsel %vm433_vm2, %v287_v43, -inf  ;;  %v553_v40 = vsel %vm433_vm2, %v349_v50, -inf  ;;  %v560_v58 = vsel %vm433_vm2, %v350_v51, -inf }
  0x4b   : > { %1045 = vst.msk [vmem:[#allocation2 + $0x21] sm:$0xff] %vm272_vm0, %v992_v56  ;;  %v547_v59 = vrot.slane %v546_v57, 4  ;;  %v554_v60 = vrot.slane %v553_v40, 4  ;;  %v561_v61 = vrot.slane %v560_v58, 4  ;;  %v567_v62 = vsel %vm433_vm2, %v351_v0, -inf }
  0x4c   : > { %v568_v1 = vrot.slane %v567_v62, 4  ;;  %v574_v2 = vsel %vm433_vm2, %v290_v48, -inf  ;;  %v581_v3 = vsel %vm433_vm2, %v352_v53, -inf  ;;  %v588_v4 = vsel %vm433_vm2, %v353_v54, -inf  ;;  %v254_v53 = vld [vmem:[%s2717_s16 + $0x70] sm:$0xff] }
  0x4d   : > { %v548_v5 = vmax.f32 %v546_v57, %v547_v59  ;;  %v555_v6 = vmax.f32 %v553_v40, %v554_v60  ;;  %v562_v7 = vmax.f32 %v560_v58, %v561_v61  ;;  %v575_v8 = vrot.slane %v574_v2, 4  ;;  %v253_v61 = vld [vmem:[%s2717_s16 + $0x68] sm:$0xff] }
  0x4e   : > { %v2848_v9 = vld [vmem:[#allocation2 + $0x10] sm:$0xff]  ;;  %v2850_v10 = vld [vmem:[#allocation2 + $0x18] sm:$0x3]  ;;  %v569_v11 = vmax.f32 %v567_v62, %v568_v1  ;;  %v582_v12 = vrot.slane %v581_v3, 4  ;;  %v589_v13 = vrot.slane %v588_v4, 4  ;;  %v595_v18 = vsel %vm433_vm2, %v354_v55, -inf }
  0x4f   : > { %1192 = vrot.lane.b32.xlu1 %v2848_v9, %s2603_s25  ;;  %v1146_v15 = vrot.slane %v2848_v9, 2  ;;  %v549_v16 = vrot.slane %v548_v5, 2  ;;  %v556_v17 = vrot.slane %v555_v6, 2  ;;  %v563_v19 = vrot.slane %v562_v7, 2  ;;  %v255_v62 = vld [vmem:[%s2717_s16 + $0x78] sm:$0xff] }
  0x50   : > { %v570_v20 = vrot.slane %v569_v11, 2  ;;  %v576_v21 = vmax.f32 %v574_v2, %v575_v8  ;;  %v583_v22 = vmax.f32 %v581_v3, %v582_v12  ;;  %v1147_v23 = vrot.slane %v2850_v10, 2 }
  0x51   : > { %v550_v24 = vmax.f32 %v548_v5, %v549_v16  ;;  %v557_v25 = vmax.f32 %v555_v6, %v556_v17  ;;  %v590_v26 = vmax.f32 %v588_v4, %v589_v13  ;;  %v564_v29 = vmax.f32 %v562_v7, %v563_v19  ;;  %v256_v17 = vld [vmem:[%s2717_s16 + $0x80] sm:$0xff] }
  0x52   : > { %v1056_v27 = vld [vmem:[#allocation2 + $0x20] sm:$0xff]  ;;  %v1057_v28 = vld [vmem:[#allocation2 + $0x28] sm:$0x3]  ;;  %v571_v30 = vmax.f32 %v569_v11, %v570_v20  ;;  %v577_v31 = vrot.slane %v576_v21, 2  ;;  %v584_v32 = vrot.slane %v583_v22, 2  ;;  %v596_v51 = vrot.slane %v595_v18, 4 }
  0x53   : > { %v1100_v33 = vrot.slane %v1056_v27, 1  ;;  %v1101_v34 = vrot.slane %v1057_v28, 1  ;;  %1272 = vrot.lane.b32.xlu2 %v1056_v27, %s2604_s26  ;;  %v551_v35 = vrot.slane %v550_v24, 1  ;;  %v558_v36 = vrot.slane %v557_v25, 1 }
  0x54   : > { %v565_v37 = vrot.slane %v564_v29, 1  ;;  %v572_v38 = vrot.slane %v571_v30, 1  ;;  %v578_v39 = vmax.f32 %v576_v21, %v577_v31  ;;  %v585_v41 = vmax.f32 %v583_v22, %v584_v32 }
  0x55   : > { %v2862_v42 = vsel %vm1093_vm3, %v1100_v33, %v1101_v34  ;;  %v552_v43 = vmax.f32 %v550_v24, %v551_v35  ;;  %v559_v44 = vmax.f32 %v557_v25, %v558_v36  ;;  %v591_v45 = vrot.slane %v590_v26, 2 }
  0x56   : > { %1300 = vrot.lane.b32.xlu0 %v2862_v42, %s2605_s30  ;;  %v566_v46 = vmax.f32 %v564_v29, %v565_v37  ;;  %v573_v47 = vmax.f32 %v571_v30, %v572_v38  ;;  %v579_v48 = vrot.slane %v578_v39, 1  ;;  %v586_v49 = vrot.slane %v585_v41, 1 }
  0x57   : > { %1194 = vrot.lane.b32.xlu1 %v1056_v27, %s2603_s25  ;;  %v592_v50 = vmax.f32 %v590_v26, %v591_v45  ;;  %v993_v0 = vsel %vm972_vm5, %v559_v44, %v552_v43  ;;  %v1149_v52 = vrot.slane %v1056_v27, 2  ;;  %v1150_v57 = vrot.slane %v1057_v28, 2 }
  0x58   : > { %v580_v54 = vmax.f32 %v578_v39, %v579_v48  ;;  %v587_v55 = vmax.f32 %v585_v41, %v586_v49  ;;  %v994_v56 = vsel %vm974_vm6, %v566_v46, %v993_v0  ;;  %v597_v58 = vmax.f32 %v595_v18, %v596_v51 }
  0x59   : > { %v593_v40 = vrot.slane %v592_v50, 1  ;;  %v995_v59 = vsel %vm976_vm7, %v573_v47, %v994_v56  ;;  %v1097_v60 = vrot.slane %v2848_v9, 1  ;;  %v1148_v63 = vsel %vm1142_vm4, %v1146_v15, %v1147_v23 }
  0x5a   : > { %v996_v1 = vsel %vm978_vm8, %v580_v54, %v995_v59  ;;  %v1098_v2 = vrot.slane %v2850_v10, 1  ;;  %v292_v3 = vsel %vm272_vm0, %v254_v53, -inf  ;;  %v598_v5 = vrot.slane %v597_v58, 2 }
  0x5b   : > { %v594_v4 = vmax.f32 %v592_v50, %v593_v40  ;;  %v997_v6 = vsel %vm980_vm9, %v587_v55, %v996_v1  ;;  %1247 = vrot.lane.b32.xlu2 %v1148_v63, %s2606_s6  ;;  %v293_v7 = vmax.f32 %v2853_v14, %v292_v3  ;;  %v2882_v8 = vsel %vm1142_vm4, %v1149_v52, %v1150_v57 }
  0x5c   : > { %v2885_v9 = vsel %vm1093_vm3, %v1097_v60, %v1098_v2  ;;  %v294_v10 = vsel %vm272_vm0, %v253_v61, -inf  ;;  %v295_v11 = vsel %vm272_vm0, %v255_v62, -inf  ;;  %v599_v12 = vmax.f32 %v597_v58, %v598_v5 }
  0x5d   : > { %v998_v13 = vsel %vm982_vm10, %v594_v4, %v997_v6  ;;  %v296_v15 = vmax.f32 %v294_v10, %v295_v11  ;;  %v355_v16 = vrot.slane %v293_v7, 2  ;;  %v356_v18 = vrot.slane %v293_v7, 4 }
  0x5e   : > { %1169 = vrot.lane.b32.xlu0 %v1148_v63, %s2602_s23  ;;  %v357_v14 = vrot.slane %v293_v7, 6  ;;  %v602_v19 = vsel %vm433_vm2, %v293_v7, -inf  ;;  %v2894_v20 = vsel %vm272_vm0, %v256_v17, -inf  ;;  %v600_v21 = vrot.slane %v599_v12, 1 }
  0x5f   : > { %v358_v22 = vrot.slane %v296_v15, 2  ;;  %v359_v23 = vrot.slane %v296_v15, 4  ;;  %v360_v24 = vrot.slane %v296_v15, 6  ;;  %v603_v25 = vrot.slane %v602_v19, 4 }
  0x60   : > { %v609_v26 = vsel %vm433_vm2, %v355_v16, -inf  ;;  %v616_v27 = vsel %vm433_vm2, %v356_v18, -inf  ;;  %v623_v28 = vsel %vm433_vm2, %v357_v14, -inf  ;;  %v601_v29 = vmax.f32 %v599_v12, %v600_v21 }
  0x61   : > { %v610_v30 = vrot.slane %v609_v26, 4  ;;  %v617_v31 = vrot.slane %v616_v27, 4  ;;  %v624_v32 = vrot.slane %v623_v28, 4  ;;  %v604_v33 = vmax.f32 %v602_v19, %v603_v25  ;;  %v259_v25 = vld [vmem:[%s2717_s16 + $0x98] sm:$0xff] }
  0x62   : > { %v630_v34 = vsel %vm433_vm2, %v296_v15, -inf  ;;  %v637_v35 = vsel %vm433_vm2, %v358_v22, -inf  ;;  %v644_v36 = vsel %vm433_vm2, %v359_v23, -inf  ;;  %v999_v37 = vsel %vm984_vm11, %v601_v29, %v998_v13  ;;  %v257_v23 = vld [vmem:[%s2717_s16 + $0x88] sm:$0xff] }
  0x63   : > { %1120 = vrot.lane.b32.xlu2 %v2885_v9, %s2601_s17  ;;  %v611_v38 = vmax.f32 %v609_v26, %v610_v30  ;;  %v618_v39 = vmax.f32 %v616_v27, %v617_v31  ;;  %v625_v41 = vmax.f32 %v623_v28, %v624_v32  ;;  %1046 = vst.msk [vmem:[#allocation2 + $0x31] sm:$0xff] %vm272_vm0, %v999_v37  ;;  %v605_v43 = vrot.slane %v604_v33, 2 }
  0x64   : > { %v631_v44 = vrot.slane %v630_v34, 4  ;;  %v638_v45 = vrot.slane %v637_v35, 4  ;;  %v645_v46 = vrot.slane %v644_v36, 4  ;;  %v651_v50 = vsel %vm433_vm2, %v360_v24, -inf  ;;  %v258_v24 = vld [vmem:[%s2717_s16 + $0x90] sm:$0xff] }
  0x65   : > { %v612_v47 = vrot.slane %v611_v38, 2  ;;  %v619_v48 = vrot.slane %v618_v39, 2  ;;  %v626_v49 = vrot.slane %v625_v41, 2  ;;  %v606_v51 = vmax.f32 %v604_v33, %v605_v43 }
  0x66   : > { %1249 = vrot.lane.b32.xlu0 %v2882_v8, %s2606_s6  ;;  %v632_v0 = vmax.f32 %v630_v34, %v631_v44  ;;  %v639_v52 = vmax.f32 %v637_v35, %v638_v45  ;;  %v646_v53 = vmax.f32 %v644_v36, %v645_v46  ;;  %v652_v57 = vrot.slane %v651_v50, 4  ;;  %v260_v34 = vld [vmem:[%s2717_s16 + $0xa0] sm:$0xff]  ;;  %v262_v35 = vld [vmem:[%s2717_s16 + $0xb0] sm:$0xff] }
  0x67   : > { %v613_v54 = vmax.f32 %v611_v38, %v612_v47  ;;  %v620_v55 = vmax.f32 %v618_v39, %v619_v48  ;;  %v627_v56 = vmax.f32 %v625_v41, %v626_v49  ;;  %v607_v40 = vrot.slane %v606_v51, 1 }
  0x68   : > { %v633_v58 = vrot.slane %v632_v0, 2  ;;  %v640_v59 = vrot.slane %v639_v52, 2  ;;  %v647_v60 = vrot.slane %v646_v53, 2  ;;  %v653_v1 = vmax.f32 %v651_v50, %v652_v57 }
  0x69   : > { %v614_v61 = vrot.slane %v613_v54, 1  ;;  %v621_v62 = vrot.slane %v620_v55, 1  ;;  %v628_v63 = vrot.slane %v627_v56, 1  ;;  %v608_v2 = vmax.f32 %v606_v51, %v607_v40 }
  0x6a   : > { %v634_v3 = vmax.f32 %v632_v0, %v633_v58  ;;  %v641_v4 = vmax.f32 %v639_v52, %v640_v59  ;;  %v648_v5 = vmax.f32 %v646_v53, %v647_v60  ;;  %v2909_v6 = vld [vmem:[#allocation2 + $0x30] sm:$0xff]  ;;  %v1059_v7 = vld [vmem:[#allocation2 + $0x38] sm:$0x3]  ;;  %v654_v13 = vrot.slane %v653_v1, 2 }
  0x6b   : > { %1222 = vrot.lane.b32.xlu2 %v2862_v42, %s2607_s7  ;;  %v615_v10 = vmax.f32 %v613_v54, %v614_v61  ;;  %v622_v11 = vmax.f32 %v620_v55, %v621_v62  ;;  %v629_v12 = vmax.f32 %v627_v56, %v628_v63  ;;  %1274 = vrot.lane.b32.xlu1 %v2909_v6, %s2604_s26  ;;  %v1152_v15 = vrot.slane %v2909_v6, 2 }
  0x6c   : > { %v1153_v16 = vrot.slane %v1059_v7, 2  ;;  %v635_v17 = vrot.slane %v634_v3, 1  ;;  %v642_v18 = vrot.slane %v641_v4, 1  ;;  %v649_v14 = vrot.slane %v648_v5, 1 }
  0x6d   : > { %v655_v19 = vmax.f32 %v653_v1, %v654_v13  ;;  %v1000_v21 = vsel %vm972_vm5, %v615_v10, %v608_v2  ;;  %v1103_v22 = vrot.slane %v2909_v6, 1  ;;  %v1104_v33 = vrot.slane %v1059_v7, 1 }
  0x6e   : > { %v2922_v26 = vsel %vm1142_vm4, %v1152_v15, %v1153_v16  ;;  %v636_v27 = vmax.f32 %v634_v3, %v635_v17  ;;  %v643_v28 = vmax.f32 %v641_v4, %v642_v18  ;;  %v1001_v29 = vsel %vm974_vm6, %v622_v11, %v1000_v21 }
  0x6f   : > { %1329 = vrot.lane.b32.xlu0 %v2922_v26, %s2608_s8  ;;  %v650_v30 = vmax.f32 %v648_v5, %v649_v14  ;;  %v656_v31 = vrot.slane %v655_v19, 1  ;;  %v1002_v32 = vsel %vm976_vm7, %v629_v12, %v1001_v29  ;;  %v298_v37 = vsel %vm272_vm0, %v258_v24, -inf }
  0x70   : > { %v1003_v36 = vsel %vm978_vm8, %v636_v27, %v1002_v32  ;;  %v300_v38 = vsel %vm272_vm0, %v257_v23, -inf  ;;  %v301_v39 = vsel %vm272_vm0, %v259_v25, -inf  ;;  %v2936_v44 = vsel %vm1093_vm3, %v1103_v22, %v1104_v33 }
  0x71   : > { %v657_v41 = vmax.f32 %v655_v19, %v656_v31  ;;  %v1004_v43 = vsel %vm980_vm9, %v643_v28, %v1003_v36  ;;  %v299_v45 = vmax.f32 %v2894_v20, %v298_v37  ;;  %v302_v47 = vmax.f32 %v300_v38, %v301_v39 }
  0x72   : > { %v1005_v46 = vsel %vm982_vm10, %v650_v30, %v1004_v43  ;;  %v2941_v48 = vsel %vm272_vm0, %v260_v34, -inf  ;;  %v2944_v49 = vsel %vm272_vm0, %v262_v35, -inf  ;;  %vm1386_vm1 = vcmask 162816  }
  0x73   : > { %v1006_v50 = vsel %vm984_vm11, %v657_v41, %v1005_v46  ;;  %1302 = vrot.lane.b32.xlu2 %v2936_v44, %s2605_s30  ;;  %v361_v51 = vrot.slane %v299_v45, 2  ;;  %v362_v0 = vrot.slane %v299_v45, 4  ;;  %v363_v52 = vrot.slane %v299_v45, 6  ;;  %1220 = vrot.lane.b32.xlu1 %v2885_v9, %s2607_s7 }
  0x74   : > { %1047 = vst.msk [vmem:[#allocation2 + $0x41] sm:$0xff] %vm272_vm0, %v1006_v50  ;;  %v364_v20 = vrot.slane %v302_v47, 2  ;;  %v365_v53 = vrot.slane %v302_v47, 4  ;;  %v366_v54 = vrot.slane %v302_v47, 6  ;;  %v658_v55 = vsel %vm433_vm2, %v299_v45, -inf }
  0x75   : > { %v659_v56 = vrot.slane %v658_v55, 4  ;;  %v665_v57 = vsel %vm433_vm2, %v361_v51, -inf  ;;  %v672_v40 = vsel %vm433_vm2, %v362_v0, -inf  ;;  %v679_v58 = vsel %vm433_vm2, %v363_v52, -inf }
  0x76   : > { %v666_v59 = vrot.slane %v665_v57, 4  ;;  %v673_v60 = vrot.slane %v672_v40, 4  ;;  %v680_v61 = vrot.slane %v679_v58, 4  ;;  %v686_v62 = vsel %vm433_vm2, %v302_v47, -inf  ;;  %v261_v47 = vld [vmem:[%s2717_s16 + $0xa8] sm:$0xff] }
  0x77   : > { %1196 = vrot.lane.b32.xlu0 %v2909_v6, %s2603_s25  ;;  %v660_v9 = vmax.f32 %v658_v55, %v659_v56  ;;  %v687_v63 = vrot.slane %v686_v62, 4  ;;  %v693_v1 = vsel %vm433_vm2, %v364_v20, -inf  ;;  %v700_v2 = vsel %vm433_vm2, %v365_v53, -inf  ;;  %v263_v56 = vld [vmem:[%s2717_s16 + $0xb8] sm:$0xff] }
  0x78   : > { %v667_v3 = vmax.f32 %v665_v57, %v666_v59  ;;  %v674_v4 = vmax.f32 %v672_v40, %v673_v60  ;;  %v681_v5 = vmax.f32 %v679_v58, %v680_v61  ;;  %v694_v7 = vrot.slane %v693_v1, 4 }
  0x79   : > { %v661_v10 = vrot.slane %v660_v9, 2  ;;  %v688_v11 = vmax.f32 %v686_v62, %v687_v63  ;;  %v701_v12 = vrot.slane %v700_v2, 4  ;;  %v707_v13 = vsel %vm433_vm2, %v366_v54, -inf }
  0x7a   : > { %v668_v15 = vrot.slane %v667_v3, 2  ;;  %v675_v16 = vrot.slane %v674_v4, 2  ;;  %v682_v17 = vrot.slane %v681_v5, 2  ;;  %v695_v18 = vmax.f32 %v693_v1, %v694_v7 }
  0x7b   : > { %v2962_v6 = vld [vmem:[#allocation2 + $0x40] sm:$0xff]  ;;  %v1061_v14 = vld [vmem:[#allocation2 + $0x48] sm:$0x3]  ;;  %1171 = vrot.lane.b32.xlu2 %v2882_v8, %s2602_s23  ;;  %v662_v19 = vmax.f32 %v660_v9, %v661_v10  ;;  %v689_v21 = vrot.slane %v688_v11, 2  ;;  %v702_v22 = vmax.f32 %v700_v2, %v701_v12  ;;  %v708_v23 = vrot.slane %v707_v13, 4  ;;  %1327 = vrot.lane.b32.xlu1 %v2882_v8, %s2608_s8 }
  0x7c   : > { %v1106_v24 = vrot.slane %v2962_v6, 1  ;;  %v1107_v25 = vrot.slane %v1061_v14, 1  ;;  %v669_v27 = vmax.f32 %v667_v3, %v668_v15  ;;  %v676_v28 = vmax.f32 %v674_v4, %v675_v16 }
  0x7d   : > { %v663_v29 = vrot.slane %v662_v19, 1  ;;  %v683_v30 = vmax.f32 %v681_v5, %v682_v17  ;;  %v690_v31 = vmax.f32 %v688_v11, %v689_v21  ;;  %v696_v32 = vrot.slane %v695_v18, 2 }
  0x7e   : > { %v2970_v33 = vsel %vm1093_vm3, %v1106_v24, %v1107_v25  ;;  %v670_v34 = vrot.slane %v669_v27, 1  ;;  %v677_v35 = vrot.slane %v676_v28, 1  ;;  %v703_v36 = vrot.slane %v702_v22, 2 }
  0x7f   : > { %1276 = vrot.lane.b32.xlu0 %v2962_v6, %s2604_s26  ;;  %v664_v8 = vmax.f32 %v662_v19, %v663_v29  ;;  %v684_v37 = vrot.slane %v683_v30, 1  ;;  %v691_v38 = vrot.slane %v690_v31, 1  ;;  %v697_v39 = vmax.f32 %v695_v18, %v696_v32 }
  0x80   : > { %v671_v41 = vmax.f32 %v669_v27, %v670_v34  ;;  %v678_v43 = vmax.f32 %v676_v28, %v677_v35  ;;  %v704_v45 = vmax.f32 %v702_v22, %v703_v36  ;;  %v709_v46 = vmax.f32 %v707_v13, %v708_v23 }
  0x81   : > { %v685_v50 = vmax.f32 %v683_v30, %v684_v37  ;;  %v692_v51 = vmax.f32 %v690_v31, %v691_v38  ;;  %v698_v0 = vrot.slane %v697_v39, 1  ;;  %v1155_v52 = vrot.slane %v2962_v6, 2 }
  0x82   : > { %v705_v20 = vrot.slane %v704_v45, 1  ;;  %v710_v53 = vrot.slane %v709_v46, 2  ;;  %v1007_v54 = vsel %vm972_vm5, %v671_v41, %v664_v8  ;;  %v1156_v55 = vrot.slane %v1061_v14, 2 }
  0x83   : > { %1251 = vrot.lane.b32.xlu2 %v2922_v26, %s2606_s6  ;;  %v699_v57 = vmax.f32 %v697_v39, %v698_v0  ;;  %v1008_v40 = vsel %vm974_vm6, %v678_v43, %v1007_v54  ;;  %v305_v58 = vmax.f32 %v2941_v48, %v2944_v49  ;;  %v306_v59 = vsel %vm272_vm0, %v261_v47, -inf  ;;  %1122 = vrot.lane.b32.xlu1 %v2862_v42, %s2601_s17 }
  0x84   : > { %v706_v60 = vmax.f32 %v704_v45, %v705_v20  ;;  %v711_v61 = vmax.f32 %v709_v46, %v710_v53  ;;  %v1009_v62 = vsel %vm976_vm7, %v685_v50, %v1008_v40  ;;  %v2988_v9 = vsel %vm1142_vm4, %v1155_v52, %v1156_v55 }
  0x85   : > { %v1010_v63 = vsel %vm978_vm8, %v692_v51, %v1009_v62  ;;  %v307_v1 = vsel %vm272_vm0, %v263_v56, -inf  ;;  %v367_v2 = vrot.slane %v305_v58, 2  ;;  %v368_v3 = vrot.slane %v305_v58, 4 }
  0x86   : > { %v712_v4 = vrot.slane %v711_v61, 1  ;;  %v1011_v48 = vsel %vm980_vm9, %v699_v57, %v1010_v63  ;;  %v308_v49 = vmax.f32 %v306_v59, %v307_v1  ;;  %v369_v5 = vrot.slane %v305_v58, 6 }
  0x87   : > { %1124 = vrot.lane.b32.xlu0 %v2936_v44, %s2601_s17  ;;  %v1012_v42 = vsel %vm982_vm10, %v706_v60, %v1011_v48  ;;  %v714_v7 = vsel %vm433_vm2, %v305_v58, -inf  ;;  %v721_v10 = vsel %vm433_vm2, %v367_v2, -inf  ;;  %v728_v11 = vsel %vm433_vm2, %v368_v3, -inf  ;;  %v264_v48 = vld [vmem:[%s2717_s16 + $0xc0] sm:$0xff] }
  0x88   : > { %v713_v12 = vmax.f32 %v711_v61, %v712_v4  ;;  %v370_v13 = vrot.slane %v308_v49, 2  ;;  %v371_v15 = vrot.slane %v308_v49, 4  ;;  %v372_v16 = vrot.slane %v308_v49, 6 }
  0x89   : > { %v715_v17 = vrot.slane %v714_v7, 4  ;;  %v722_v18 = vrot.slane %v721_v10, 4  ;;  %v729_v14 = vrot.slane %v728_v11, 4  ;;  %v735_v19 = vsel %vm433_vm2, %v369_v5, -inf }
  0x8a   : > { %v1013_v21 = vsel %vm984_vm11, %v713_v12, %v1012_v42  ;;  %v736_v22 = vrot.slane %v735_v19, 4  ;;  %v742_v23 = vsel %vm433_vm2, %v308_v49, -inf  ;;  %v749_v24 = vsel %vm433_vm2, %v370_v13, -inf  ;;  %v266_v49 = vld [vmem:[%s2717_s16 + $0xd0] sm:$0xff]  ;;  %v265_v13 = vld [vmem:[%s2717_s16 + $0xc8] sm:$0xff] }
  0x8b   : > { %1048 = vst.msk [vmem:[#allocation2 + $0x51] sm:$0xff] %vm272_vm0, %v1013_v21  ;;  %1331 = vrot.lane.b32.xlu2 %v2988_v9, %s2608_s8  ;;  %v716_v25 = vmax.f32 %v714_v7, %v715_v17  ;;  %v723_v27 = vmax.f32 %v721_v10, %v722_v18  ;;  %v730_v28 = vmax.f32 %v728_v11, %v729_v14  ;;  %v743_v29 = vrot.slane %v742_v23, 4 }
  0x8c   : > { %1224 = vrot.lane.b32.xlu1 %v2936_v44, %s2607_s7  ;;  %v737_v30 = vmax.f32 %v735_v19, %v736_v22  ;;  %v750_v31 = vrot.slane %v749_v24, 4  ;;  %v756_v32 = vsel %vm433_vm2, %v371_v15, -inf  ;;  %v763_v34 = vsel %vm433_vm2, %v372_v16, -inf  ;;  %v267_v15 = vld [vmem:[%s2717_s16 + $0xd8] sm:$0xff] }
  0x8d   : > { %v717_v35 = vrot.slane %v716_v25, 2  ;;  %v724_v36 = vrot.slane %v723_v27, 2  ;;  %v731_v8 = vrot.slane %v730_v28, 2  ;;  %v744_v37 = vmax.f32 %v742_v23, %v743_v29 }
  0x8e   : > { %v738_v38 = vrot.slane %v737_v30, 2  ;;  %v751_v39 = vmax.f32 %v749_v24, %v750_v31  ;;  %v757_v41 = vrot.slane %v756_v32, 4  ;;  %v764_v43 = vrot.slane %v763_v34, 4 }
  0x8f   : > { %1198 = vrot.lane.b32.xlu0 %v2962_v6, %s2603_s25  ;;  %v718_v45 = vmax.f32 %v716_v25, %v717_v35  ;;  %v725_v46 = vmax.f32 %v723_v27, %v724_v36  ;;  %v732_v44 = vmax.f32 %v730_v28, %v731_v8  ;;  %v745_v47 = vrot.slane %v744_v37, 2 }
  0x90   : > { %v739_v50 = vmax.f32 %v737_v30, %v738_v38  ;;  %v752_v51 = vrot.slane %v751_v39, 2  ;;  %v758_v0 = vmax.f32 %v756_v32, %v757_v41  ;;  %v765_v52 = vmax.f32 %v763_v34, %v764_v43 }
  0x91   : > { %v719_v20 = vrot.slane %v718_v45, 1  ;;  %v726_v53 = vrot.slane %v725_v46, 1  ;;  %v733_v54 = vrot.slane %v732_v44, 1  ;;  %v746_v55 = vmax.f32 %v744_v37, %v745_v47 }
  0x92   : > { %v740_v56 = vrot.slane %v739_v50, 1  ;;  %v753_v57 = vmax.f32 %v751_v39, %v752_v51  ;;  %v759_v40 = vrot.slane %v758_v0, 2  ;;  %v766_v58 = vrot.slane %v765_v52, 2  ;;  %v3016_v63 = vld [vmem:[#allocation2 + $0x50] sm:$0xff]  ;;  %v1063_v28 = vld [vmem:[#allocation2 + $0x58] sm:$0x3] }
  0x93   : > { %1126 = vrot.lane.b32.xlu2 %v2970_v33, %s2601_s17  ;;  %v720_v59 = vmax.f32 %v718_v45, %v719_v20  ;;  %v727_v60 = vmax.f32 %v725_v46, %v726_v53  ;;  %v734_v61 = vmax.f32 %v732_v44, %v733_v54  ;;  %v747_v62 = vrot.slane %v746_v55, 1 }
  0x94   : > { %1304 = vrot.lane.b32.xlu1 %v2970_v33, %s2605_s30  ;;  %v741_v1 = vmax.f32 %v739_v50, %v740_v56  ;;  %v754_v2 = vrot.slane %v753_v57, 1  ;;  %v760_v3 = vmax.f32 %v758_v0, %v759_v40  ;;  %v767_v4 = vmax.f32 %v765_v52, %v766_v58 }
  0x95   : > { %v748_v5 = vmax.f32 %v746_v55, %v747_v62  ;;  %v1014_v42 = vsel %vm972_vm5, %v727_v60, %v720_v59  ;;  %v309_v17 = vsel %vm272_vm0, %v264_v48, -inf  ;;  %v310_v18 = vsel %vm272_vm0, %v266_v49, -inf }
  0x96   : > { %v755_v7 = vmax.f32 %v753_v57, %v754_v2  ;;  %v761_v10 = vrot.slane %v760_v3, 1  ;;  %v768_v11 = vrot.slane %v767_v4, 1  ;;  %v1015_v12 = vsel %vm974_vm6, %v734_v61, %v1014_v42 }
  0x97   : > { %1200 = vrot.lane.b32.xlu0 %v3016_v63, %s2603_s25  ;;  %v1016_v16 = vsel %vm976_vm7, %v741_v1, %v1015_v12  ;;  %v311_v22 = vmax.f32 %v309_v17, %v310_v18  ;;  %v312_v24 = vsel %vm272_vm0, %v265_v13, -inf  ;;  %v313_v25 = vsel %vm272_vm0, %v267_v15, -inf }
  0x98   : > { %v762_v14 = vmax.f32 %v760_v3, %v761_v10  ;;  %v769_v19 = vmax.f32 %v767_v4, %v768_v11  ;;  %v1017_v21 = vsel %vm978_vm8, %v748_v5, %v1016_v16  ;;  %v314_v29 = vmax.f32 %v312_v24, %v313_v25 }
  0x99   : > { %v1018_v23 = vsel %vm980_vm9, %v755_v7, %v1017_v21  ;;  %v373_v30 = vrot.slane %v311_v22, 2  ;;  %v374_v31 = vrot.slane %v311_v22, 4  ;;  %v1158_v34 = vrot.slane %v3016_v63, 2 }
  0x9a   : > { %v1019_v27 = vsel %vm982_vm10, %v762_v14, %v1018_v23  ;;  %v1109_v35 = vrot.slane %v3016_v63, 1  ;;  %v375_v36 = vrot.slane %v311_v22, 6  ;;  %v1110_v8 = vrot.slane %v1063_v28, 1  ;;  %v268_v14 = vld [vmem:[%s2717_s16 + $0xe0] sm:$0xff] }
  0x9b   : > { %v1020_v32 = vsel %vm984_vm11, %v769_v19, %v1019_v27  ;;  %1226 = vrot.lane.b32.xlu2 %v2970_v33, %s2607_s7  ;;  %v376_v37 = vrot.slane %v314_v29, 2  ;;  %v377_v38 = vrot.slane %v314_v29, 4  ;;  %v770_v39 = vsel %vm433_vm2, %v311_v22, -inf }
  0x9c   : > { %1173 = vrot.lane.b32.xlu1 %v2922_v26, %s2602_s23  ;;  %1049 = vst.msk [vmem:[#allocation2 + $0x61] sm:$0xff] %vm272_vm0, %v1020_v32  ;;  %v1159_v41 = vrot.slane %v1063_v28, 2  ;;  %v378_v43 = vrot.slane %v314_v29, 6  ;;  %v771_v45 = vrot.slane %v770_v39, 4  ;;  %v777_v46 = vsel %vm433_vm2, %v373_v30, -inf }
  0x9d   : > { %v778_v44 = vrot.slane %v777_v46, 4  ;;  %v784_v33 = vsel %vm433_vm2, %v374_v31, -inf  ;;  %v791_v47 = vsel %vm433_vm2, %v375_v36, -inf  ;;  %v798_v50 = vsel %vm433_vm2, %v314_v29, -inf  ;;  %v270_v29 = vld [vmem:[%s2717_s16 + $0xf0] sm:$0xff] }
  0x9e   : > { %v772_v26 = vmax.f32 %v770_v39, %v771_v45  ;;  %v785_v51 = vrot.slane %v784_v33, 4  ;;  %v792_v0 = vrot.slane %v791_v47, 4  ;;  %v799_v52 = vrot.slane %v798_v50, 4  ;;  %v271_v45 = vld [vmem:[%s2717_s16 + $0xf8] sm:$0xff] }
  0x9f   : > { %1278 = vrot.lane.b32.xlu0 %v3016_v63, %s2604_s26  ;;  %v3050_v20 = vsel %vm1093_vm3, %v1109_v35, %v1110_v8  ;;  %v779_v53 = vmax.f32 %v777_v46, %v778_v44  ;;  %v805_v54 = vsel %vm433_vm2, %v376_v37, -inf  ;;  %v812_v55 = vsel %vm433_vm2, %v377_v38, -inf  ;;  %v269_v38 = vld [vmem:[%s2717_s16 + $0xe8] sm:$0xff]  ;;  %s2294_s16 = sshll.u32 %s2291_s14, 4  ;;  %s2295_s16 = int_to_ptr.hbm [resolvable:$true] %s2294_s16 }
  0xa0   : > { %v773_v56 = vrot.slane %v772_v26, 2  ;;  %v786_v57 = vmax.f32 %v784_v33, %v785_v51  ;;  %v793_v40 = vmax.f32 %v791_v47, %v792_v0  ;;  %v800_v58 = vmax.f32 %v798_v50, %v799_v52  ;;  %s2543_s9 = sshra.s32 %s2295_s16, 4  ;;  %s2544_s9 = int_to_ptr.hbm [resolvable:$true] %s2543_s9 }
  0xa1   : > { %v780_v59 = vrot.slane %v779_v53, 2  ;;  %v806_v60 = vrot.slane %v805_v54, 4  ;;  %v819_v61 = vsel %vm433_vm2, %v378_v43, -inf  ;;  %v3062_v49 = vsel %vm1142_vm4, %v1158_v34, %v1159_v41  ;;  %s2545_s10 = scalar_lea.hbm %s2544_s9, 64  ;;  %p2550_p3 = scmp.lt.s32.totalorder %s2544_s9, %s3691_s5 }
  0xa2   : > { %v774_v2 = vmax.f32 %v772_v26, %v773_v56  ;;  %v787_v3 = vrot.slane %v786_v57, 2  ;;  %v794_v4 = vrot.slane %v793_v40, 2  ;;  %v801_v48 = vrot.slane %v800_v58, 2  ;;  %p2546_p0 = scmp.ne.s32.totalorder %s2544_s9, %s2545_s10 }
  0xa3   : > { %v3055_v62 = vld [vmem:[#allocation2 + $0x60] sm:$0xff]  ;;  %v1065_v1 = vld [vmem:[#allocation2 + $0x68] sm:$0x3]  ;;  %1228 = vrot.lane.b32.xlu2 %v3050_v20, %s2607_s7  ;;  %v813_v7 = vrot.slane %v812_v55, 4  ;;  %v781_v12 = vmax.f32 %v779_v53, %v780_v59  ;;  %v820_v13 = vrot.slane %v819_v61, 4  ;;  %v807_v23 = vmax.f32 %v805_v54, %v806_v60 }
  0xa4   : > { %1175 = vrot.lane.b32.xlu1 %v2988_v9, %s2602_s23  ;;  %v1161_v5 = vrot.slane %v3055_v62, 2  ;;  %v1162_v42 = vrot.slane %v1065_v1, 2  ;;  %v1112_v10 = vrot.slane %v3055_v62, 1  ;;  %v775_v11 = vrot.slane %v774_v2, 1  ;;  %p2547_p1 = pnand %p2546_p0, %p2678_p5 }
  0xa5   : > { %v1113_v15 = vrot.slane %v1065_v1, 1  ;;  %v788_v16 = vmax.f32 %v786_v57, %v787_v3  ;;  %v795_v17 = vmax.f32 %v793_v40, %v794_v4  ;;  %v802_v18 = vmax.f32 %v800_v58, %v801_v48 }
  0xa6   : > { %v3070_v19 = vsel %vm1142_vm4, %v1161_v5, %v1162_v42  ;;  %v776_v21 = vmax.f32 %v774_v2, %v775_v11  ;;  %v782_v22 = vrot.slane %v781_v12, 1  ;;  %v814_v28 = vmax.f32 %v812_v55, %v813_v7  ;;  %p2548_p2 = pneg %p2547_p1 }
  0xa7   : > { %1280 = vrot.lane.b32.xlu0 %v3055_v62, %s2604_s26  ;;  %v789_v24 = vrot.slane %v788_v16, 1  ;;  %v796_v25 = vrot.slane %v795_v17, 1  ;;  %v803_v27 = vrot.slane %v802_v18, 1  ;;  %v808_v31 = vrot.slane %v807_v23, 2 }
  0xa8   : > { %v783_v30 = vmax.f32 %v781_v12, %v782_v22  ;;  %v821_v32 = vmax.f32 %v819_v61, %v820_v13  ;;  %v315_v34 = vsel %vm272_vm0, %v268_v14, -inf  ;;  %v815_v37 = vrot.slane %v814_v28, 2 }
  0xa9   : > { %v790_v35 = vmax.f32 %v788_v16, %v789_v24  ;;  %v797_v36 = vmax.f32 %v795_v17, %v796_v25  ;;  %v804_v8 = vmax.f32 %v802_v18, %v803_v27  ;;  %v809_v39 = vmax.f32 %v807_v23, %v808_v31  ;;  %v3106_v17 = vpop.permute.xlu0 %1118 }
  0xaa   : > { %v822_v41 = vrot.slane %v821_v32, 2  ;;  %v1021_v43 = vsel %vm972_vm5, %v783_v30, %v776_v21  ;;  %v316_v46 = vsel %vm272_vm0, %v270_v29, -inf  ;;  %v3083_v44 = vsel %vm1093_vm3, %v1112_v10, %v1113_v15 }
  0xab   : > { %1306 = vrot.lane.b32.xlu2 %v3050_v20, %s2605_s30  ;;  %v816_v33 = vmax.f32 %v814_v28, %v815_v37  ;;  %v1022_v47 = vsel %vm974_vm6, %v790_v35, %v1021_v43  ;;  %v317_v50 = vmax.f32 %v315_v34, %v316_v46  ;;  %v810_v51 = vrot.slane %v809_v39, 1 }
  0xac   : > { %1253 = vrot.lane.b32.xlu1 %v2988_v9, %s2606_s6  ;;  %v823_v0 = vmax.f32 %v821_v32, %v822_v41  ;;  %v1023_v52 = vsel %vm976_vm7, %v797_v36, %v1022_v47  ;;  %v318_v53 = vsel %vm272_vm0, %v269_v38, -inf  ;;  %v319_v9 = vsel %vm272_vm0, %v271_v45, -inf }
  0xad   : > { %v3086_v26 = vpop.permute.xlu2 %1272  ;;  %v817_v54 = vrot.slane %v816_v33, 1  ;;  %v1024_v55 = vsel %vm978_vm8, %v804_v8, %v1023_v52  ;;  %v379_v56 = vrot.slane %v317_v50, 2  ;;  %v811_v57 = vmax.f32 %v809_v39, %v810_v51 }
  0xae   : > { %v824_v40 = vrot.slane %v823_v0, 1  ;;  %v320_v58 = vmax.f32 %v318_v53, %v319_v9  ;;  %v380_v59 = vrot.slane %v317_v50, 4  ;;  %v381_v61 = vrot.slane %v317_v50, 6 }
  0xaf   : > { %1335 = vrot.lane.b32.xlu0 %v3070_v19, %s2608_s8  ;;  %v818_v60 = vmax.f32 %v816_v33, %v817_v54  ;;  %v826_v1 = vsel %vm433_vm2, %v317_v50, -inf  ;;  %v833_v2 = vsel %vm433_vm2, %v379_v56, -inf  ;;  %v1025_v4 = vsel %vm980_vm9, %v811_v57, %v1024_v55 }
  0xb0   : > { %v825_v3 = vmax.f32 %v823_v0, %v824_v40  ;;  %v382_v48 = vrot.slane %v320_v58, 2  ;;  %v383_v5 = vrot.slane %v320_v58, 4  ;;  %v384_v7 = vrot.slane %v320_v58, 6 }
  0xb1   : > { %v1026_v42 = vsel %vm982_vm10, %v818_v60, %v1025_v4  ;;  %v827_v10 = vrot.slane %v826_v1, 4  ;;  %v834_v11 = vrot.slane %v833_v2, 4  ;;  %v840_v13 = vsel %vm433_vm2, %v380_v59, -inf }
  0xb2   : > { %v1027_v12 = vsel %vm984_vm11, %v825_v3, %v1026_v42  ;;  %v847_v15 = vsel %vm433_vm2, %v381_v61, -inf  ;;  %v854_v16 = vsel %vm433_vm2, %v320_v58, -inf  ;;  %v841_v21 = vrot.slane %v840_v13, 4  ;;  %v3124_v61 = vpop.permute.xlu0 %1167 }
  0xb3   : > { %1308 = vrot.lane.b32.xlu2 %v3083_v44, %s2605_s30  ;;  %1050 = vst.msk [vmem:[#allocation2 + $0x71] sm:$0xff] %vm272_vm0, %v1027_v12  ;;  %v828_v18 = vmax.f32 %v826_v1, %v827_v10  ;;  %v835_v14 = vmax.f32 %v833_v2, %v834_v11  ;;  %v848_v23 = vrot.slane %v847_v15, 4  ;;  %v855_v24 = vrot.slane %v854_v16, 4 }
  0xb4   : > { %1255 = vrot.lane.b32.xlu1 %v3062_v49, %s2606_s6  ;;  %v861_v25 = vsel %vm433_vm2, %v382_v48, -inf  ;;  %v868_v27 = vsel %vm433_vm2, %v383_v5, -inf  ;;  %v842_v30 = vmax.f32 %v840_v13, %v841_v21  ;;  %v875_v36 = vsel %vm433_vm2, %v384_v7, -inf }
  0xb5   : > { %v3109_v22 = vpop.permute.xlu2 %1247  ;;  %v829_v28 = vrot.slane %v828_v18, 2  ;;  %v836_v29 = vrot.slane %v835_v14, 2  ;;  %v862_v31 = vrot.slane %v861_v25, 4  ;;  %v849_v32 = vmax.f32 %v847_v15, %v848_v23 }
  0xb6   : > { %v856_v34 = vmax.f32 %v854_v16, %v855_v24  ;;  %v869_v35 = vrot.slane %v868_v27, 4  ;;  %v843_v38 = vrot.slane %v842_v30, 2  ;;  %v876_v46 = vrot.slane %v875_v36, 4  ;;  %v1076_v24 = vld [vmem:[%s3687_s1 + $0x20] sm:$0xf] }
  0xb7   : > { %1202 = vrot.lane.b32.xlu0 %v3055_v62, %s2603_s25  ;;  %v830_v8 = vmax.f32 %v828_v18, %v829_v28  ;;  %v837_v37 = vmax.f32 %v835_v14, %v836_v29  ;;  %v863_v39 = vmax.f32 %v861_v25, %v862_v31  ;;  %v850_v41 = vrot.slane %v849_v32, 2  ;;  %2378 = vmatpush.msk.msra.mxu0 %vm1451_vm12, %v1076_v24  ;;  %v1075_v29 = vld [vmem:[%s3687_s1 + $0x18] sm:$0xff] }
  0xb8   : > { %v857_v43 = vrot.slane %v856_v34, 2  ;;  %v870_v45 = vmax.f32 %v868_v27, %v869_v35  ;;  %v844_v50 = vmax.f32 %v842_v30, %v843_v38  ;;  %v877_v56 = vmax.f32 %v875_v36, %v876_v46  ;;  %v1074_v30 = vld [vmem:[%s3687_s1 + $0x10] sm:$0xff]  ;;  %2394 = vmatpush.msk.msra.mxu3 %vm1451_vm12, %v1076_v24  ;;  %v1072_v38 = vld [vmem:[%s3687_s1] sm:$0xff] }
  0xb9   : > { %v831_v33 = vrot.slane %v830_v8, 1  ;;  %v838_v47 = vrot.slane %v837_v37, 1  ;;  %v864_v51 = vrot.slane %v863_v39, 2  ;;  %v851_v0 = vmax.f32 %v849_v32, %v850_v41  ;;  %1467 = vmatpush.msra.mxu0 %v1075_v29 }
  0xba   : > { %v858_v52 = vmax.f32 %v856_v34, %v857_v43  ;;  %v3120_v53 = vld [vmem:[#allocation2 + $0x70] sm:$0xff]  ;;  %v871_v9 = vrot.slane %v870_v45, 2  ;;  %v845_v40 = vrot.slane %v844_v50, 1  ;;  %v878_v48 = vrot.slane %v877_v56, 2  ;;  %v1067_v15 = vld [vmem:[#allocation2 + $0x78] sm:$0x3]  ;;  %2395 = vmatpush.msra.mxu3 %v1075_v29 }
  0xbb   : > { %1177 = vrot.lane.b32.xlu2 %v3062_v49, %s2602_s23  ;;  %v832_v54 = vmax.f32 %v830_v8, %v831_v33  ;;  %v839_v55 = vmax.f32 %v837_v37, %v838_v47  ;;  %v852_v58 = vrot.slane %v851_v0, 1  ;;  %v865_v60 = vmax.f32 %v863_v39, %v864_v51  ;;  %1468 = vmatpush.msra.mxu0 %v1074_v30  ;;  %v1073_v8 = vld [vmem:[%s3687_s1 + $0x8] sm:$0xff] }
  0xbc   : > { %1333 = vrot.lane.b32.xlu1 %v3062_v49, %s2608_s8  ;;  %v859_v59 = vrot.slane %v858_v52, 1  ;;  %v846_v1 = vmax.f32 %v844_v50, %v845_v40  ;;  %v872_v3 = vmax.f32 %v870_v45, %v871_v9  ;;  %v879_v10 = vmax.f32 %v877_v56, %v878_v48  ;;  %2396 = vmatpush.msra.mxu3 %v1074_v30 }
  0xbd   : > { %v3122_v57 = vpop.permute.xlu2 %1120  ;;  %v853_v2 = vmax.f32 %v851_v0, %v852_v58  ;;  %v866_v49 = vrot.slane %v865_v60, 1  ;;  %v1028_v5 = vsel %vm972_vm5, %v839_v55, %v832_v54  ;;  %v1164_v14 = vrot.slane %v3120_v53, 2  ;;  %1469 = vmatpush.msra.mxu0 %v1073_v8 }
  0xbe   : > { %v860_v4 = vmax.f32 %v858_v52, %v859_v59  ;;  %v873_v7 = vrot.slane %v872_v3, 1  ;;  %v1029_v11 = vsel %vm974_vm6, %v846_v1, %v1028_v5  ;;  %v880_v16 = vrot.slane %v879_v10, 1  ;;  %2397 = vmatpush.msra.mxu3 %v1073_v8  ;;  %v2495_v52 = vld [vmem:[#allocation2] sm:$0xff]  ;;  %v1071_v59 = vld [vmem:[#allocation2 + $0x98] sm:$0x3]  ;;  %v2496_v1 = vld [vmem:[#allocation2 + $0x10] sm:$0xff] }
  0xbf   : > { %1282 = vrot.lane.b32.xlu0 %v3120_v53, %s2604_s26  ;;  %v867_v42 = vmax.f32 %v865_v60, %v866_v49  ;;  %v1030_v13 = vsel %vm976_vm7, %v853_v2, %v1029_v11  ;;  %v1165_v21 = vrot.slane %v1067_v15, 2  ;;  %v1115_v34 = vrot.slane %v3120_v53, 1  ;;  %1470 = vmatpush.msra.mxu0 %v1072_v38 }
  0xc0   : > { %v874_v12 = vmax.f32 %v872_v3, %v873_v7  ;;  %v1031_v18 = vsel %vm978_vm8, %v860_v4, %v1030_v13  ;;  %v881_v25 = vmax.f32 %v879_v10, %v880_v16  ;;  %v1116_v35 = vrot.slane %v1067_v15, 1  ;;  %2398 = vmatpush.msra.mxu3 %v1072_v38 }
  0xc1   : > { %v1032_v23 = vsel %vm980_vm9, %v867_v42, %v1031_v18  ;;  %v1193_v32 = vpop.permute.xlu1 %1192  ;;  %v1166_v36 = vsel %vm1142_vm4, %v1164_v14, %v1165_v21  ;;  %v1351_v54 = vsel %vm272_vm0, %v2495_v52, %v3106_v17  ;;  %v1352_v17 = vsel %vm272_vm0, %v2496_v1, %v3122_v57  ;;  %v2498_v52 = vld [vmem:[#allocation2 + $0x30] sm:$0xff] }
  0xc2   : > { %v1033_v27 = vsel %vm982_vm10, %v874_v12, %v1032_v23  ;;  %v1117_v37 = vsel %vm1093_vm3, %v1115_v34, %v1116_v35  ;;  %v1360_v40 = vsel %vm1359_vm13, %v1351_v54, %v3124_v61  ;;  %v1325_v48 = vrot.slane %v1071_v59, 2 }
  0xc3   : > { %1257 = vrot.lane.b32.xlu2 %v3070_v19, %s2606_s6  ;;  %v1034_v31 = vsel %vm984_vm11, %v881_v25, %v1033_v27  ;;  %v1369_v60 = vsel %vm1368_vm14, %v1360_v40, %v1193_v32  ;;  %vm1395_vm2 = vcmask 195584   ;;  %vm1404_vm5 = vcmask 228352  }
  0xc4   : > { %1128 = vrot.lane.b32.xlu1 %v3050_v20, %s2601_s17  ;;  %1051 = vst.msk [vmem:[#allocation2 + $0x81] sm:$0xff] %vm272_vm0, %v1034_v31  ;;  %vm1426_vm6 = vcmask 293888   ;;  %vm1413_vm7 = vcmask 261120   ;;  %v1298_v14 = vrot.slane %v1071_v59, 1 }
  0xc5   : > { %v3143_v20 = vpop.permute.xlu2 %1222 }
  0xc7   : > { %1130 = vrot.lane.b32.xlu0 %v3083_v44, %s2601_s17 }
  0xc8   : > { %v3146_v28 = vpop.permute.xlu0 %1300 }
  0xc9   : > { %v1195_v33 = vpop.permute.xlu1 %1194 }
  0xcb   : > { %1337 = vrot.lane.b32.xlu2 %v1166_v36, %s2608_s8  ;;  %v1069_v43 = vld [vmem:[#allocation2 + $0x88] sm:$0x3] }
  0xcc   : > { %1230 = vrot.lane.b32.xlu1 %v3083_v44, %s2607_s7  ;;  %v3171_v44 = vld [vmem:[#allocation2 + $0x80] sm:$0xff]  ;;  %v1218_v46 = vrot.slane %v1069_v43, 1  ;;  %v1245_v56 = vrot.slane %v1069_v43, 2 }
  0xcd   : > { %v3169_v41 = vpop.permute.xlu2 %1302  ;;  %v1217_v45 = vrot.slane %v3171_v44, 1  ;;  %v1244_v9 = vrot.slane %v3171_v44, 2 }
  0xcf   : > { %1232 = vrot.lane.b32.xlu0 %v1117_v37, %s2607_s7  ;;  %v1219_v47 = vsel %vm1093_vm3, %v1217_v45, %v1218_v46  ;;  %v1246_v49 = vsel %vm1142_vm4, %v1244_v9, %v1245_v56 }
  0xd0   : > { %v1170_v39 = vpop.permute.xlu0 %1169 }
  0xd1   : > { %v1361_v5 = vsel %vm1359_vm13, %v1352_v17, %v1170_v39 }
  0xd2   : > { %v1370_v7 = vsel %vm1368_vm14, %v1361_v5, %v1195_v33 }
  0xd3   : > { %1204 = vrot.lane.b32.xlu2 %v3120_v53, %s2603_s25  ;;  %v1379_v13 = vsel %vm1377_vm15, %v1370_v7, %v3143_v20 }
  0xd4   : > { %1310 = vrot.lane.b32.xlu1 %v1117_v37, %s2605_s30 }
  0xd5   : > { %v3179_v51 = vpop.permute.xlu2 %1171 }
  0xd7   : > { %1312 = vrot.lane.b32.xlu0 %v1219_v47, %s2605_s30 }
  0xd8   : > { %v1250_v50 = vpop.permute.xlu0 %1249 }
  0xd9   : > { %v1388_v16 = vsel %vm1386_vm1, %v1379_v13, %v1250_v50 }
  0xdb   : > { %1284 = vrot.lane.b32.xlu2 %v3171_v44, %s2604_s26 }
  0xdc   : > { %1179 = vrot.lane.b32.xlu1 %v3070_v19, %s2602_s23  ;;  %v1070_v19 = vld [vmem:[#allocation2 + $0x90] sm:$0xff] }
  0xdd   : > { %v1275_v0 = vpop.permute.xlu1 %1274  ;;  %v1252_v58 = vpop.permute.xlu2 %1251  ;;  %v1324_v4 = vrot.slane %v1070_v19, 2  ;;  %v1297_v15 = vrot.slane %v1070_v19, 1 }
  0xde   : > { %v1397_v21 = vsel %vm1395_vm2, %v1388_v16, %v1275_v0  ;;  %v1595_v16 = vld [vmem:[#allocation4 + $0xe8] sm:$0xff] }
  0xdf   : > { %1181 = vrot.lane.b32.xlu0 %v1166_v36, %s2602_s23  ;;  %v1326_v10 = vsel %vm1142_vm4, %v1324_v4, %v1325_v48  ;;  %v1299_v23 = vsel %vm1093_vm3, %v1297_v15, %v1298_v14  ;;  %v1406_v24 = vsel %vm1404_vm5, %v1397_v21, %v3169_v41  ;;  %v1613_v15 = vld [vmem:[#allocation4 + $0x178] sm:$0xff] }
  0xe0   : > { %1872 = vmatpush.msrb.mxu3 %v1613_v15  ;;  %v1629_v14 = vld [vmem:[#allocation4 + $0x1f8] sm:$0xff]  ;;  %v1582_v15 = vld [vmem:[#allocation4 + $0x80] sm:$0xff] }
  0xe1   : > { %v1330_v55 = vpop.permute.xlu0 %1329  ;;  %1921 = vmatpush.msrb.mxu0 %v1629_v14  ;;  %v1599_v14 = vld [vmem:[#allocation4 + $0x108] sm:$0xff] }
  0xe2   : > { %v1415_v25 = vsel %vm1413_vm7, %v1406_v24, %v1330_v55 }
  0xe3   : > { %1132 = vrot.lane.b32.xlu2 %v1117_v37, %s2601_s17 }
  0xe4   : > { %1259 = vrot.lane.b32.xlu1 %v1166_v36, %s2606_s6 }
  0xe5   : > { %v1221_v2 = vpop.permute.xlu1 %1220 }
  0xe6   : > { %v1378_v61 = vsel %vm1377_vm15, %v1369_v60, %v1221_v2 }
  0xe7   : > { %1261 = vrot.lane.b32.xlu0 %v1246_v49, %s2606_s6  ;;  %v1387_v3 = vsel %vm1386_vm1, %v1378_v61, %v3109_v22  ;;  %v1332_v22 = vpop.permute.xlu2 %1331  ;;  %s232_s6 = sand.u32 1, %s2587_s19  }
  0xe8   : > { %v1396_v57 = vsel %vm1395_vm2, %v1387_v3, %v3086_v26  ;;  %s2280_s22 = scalar_lea.sflag [#allocation6], %s232_s6 }
  0xe9   : > { %v1197_v42 = vpop.permute.xlu0 %1196  ;;  %v1405_v12 = vsel %vm1404_vm5, %v1396_v57, %v3146_v28  ;;  %v2497_v28 = vld [vmem:[#allocation2 + $0x20] sm:$0xff] }
  0xeb   : > { %1234 = vrot.lane.b32.xlu2 %v1219_v47, %s2607_s7  ;;  %s2375_s7 = sshll.u32 %s232_s6, 6 }
  0xec   : > { %1339 = vrot.lane.b32.xlu1 %v1246_v49, %s2608_s8 }
  0xed   : > { %v1328_v11 = vpop.permute.xlu1 %1327 }
  0xee   : > { %v1414_v26 = vsel %vm1413_vm7, %v1405_v12, %v1328_v11  ;;  %v1597_v12 = vld [vmem:[#allocation4 + $0xf8] sm:$0xff] }
  0xef   : > { %1341 = vrot.lane.b32.xlu0 %v1326_v10, %s2608_s8  ;;  %2379 = vmatmul.msk.f32.vlgmr.msra.gmra.mxu0 %vm1426_vm6, %v1414_v26  ;;  %v1127_v27 = vpop.permute.xlu2 %1126  ;;  %v1596_v26 = vld [vmem:[#allocation4 + $0xf0] sm:$0xff]  ;;  %s3609_s8 = scalar_lea.vmem [#allocation7], %s2375_s7 }
  0xf0   : > { %v1355_v0 = vsel %vm272_vm0, %v2962_v6, %v1127_v27  ;;  %1758 = vmatpush.msra.mxu1 %v1597_v12  ;;  %2399 = vmatpush.msra.mxu2 %v1597_v12  ;;  %v1628_v27 = vld [vmem:[#allocation4 + $0x1f0] sm:$0xff]  ;;  %v1617_v12 = vld [vmem:[#allocation4 + $0x198] sm:$0xff]  ;;  %s2292_s15 = sshll.u32 %s3609_s8, 4  ;;  %s2293_s15 = int_to_ptr.vmem [resolvable:$true] %s2292_s15 }
  0xf1   : > { %v1277_v18 = vpop.permute.xlu0 %1276  ;;  %1922 = vmatpush.msrb.mxu0 %v1628_v27 }
  0xf2   : > { %1759 = vmatpush.msra.mxu1 %v1596_v26  ;;  %2400 = vmatpush.msra.mxu2 %v1596_v26 }
  0xf3   : > { %1314 = vrot.lane.b32.xlu2 %v1299_v23, %s2605_s30  ;;  %v1594_v23 = vld [vmem:[#allocation4 + $0xe0] sm:$0xff] }
  0xf4   : > { %1206 = vrot.lane.b32.xlu1 %v3171_v44, %s2603_s25  ;;  %1760 = vmatpush.msra.mxu1 %v1595_v16 }
  0xf5   : > { %v1123_v20 = vpop.permute.xlu1 %1122  ;;  %2401 = vmatpush.msra.mxu2 %v1595_v16 }
  0xf6   : > { %v1353_v29 = vsel %vm272_vm0, %v2497_v28, %v1123_v20  ;;  %1761 = vmatpush.msra.mxu1 %v1594_v23  ;;  %v1593_v28 = vld [vmem:[#allocation4 + $0xd8] sm:$0xff] }
  0xf7   : > { %2380 = vmatmul.msk.f32.gmra.mxu0 %vm1426_vm6, %v1415_v25  ;;  %v1362_v31 = vsel %vm1359_vm13, %v1353_v29, %v3179_v51  ;;  %v1227_v8 = vpop.permute.xlu2 %1226  ;;  %2402 = vmatpush.msra.mxu2 %v1594_v23 }
  0xf8   : > { %v1371_v34 = vsel %vm1368_vm14, %v1362_v31, %v1197_v42  ;;  %1762 = vmatpush.msra.mxu1 %v1593_v28  ;;  %v1610_v31 = vld [vmem:[#allocation4 + $0x160] sm:$0xff] }
  0xf9   : > { %v1125_v30 = vpop.permute.xlu0 %1124  ;;  %2403 = vmatpush.msra.mxu2 %v1593_v28  ;;  %v1614_v28 = vld [vmem:[#allocation4 + $0x180] sm:$0xff] }
  0xfa   : > { %v1354_v54 = vsel %vm272_vm0, %v2498_v52, %v1125_v30  ;;  %v1606_v52 = vld [vmem:[#allocation4 + $0x140] sm:$0xff] }
  0xfc   : > { %1286 = vrot.lane.b32.xlu1 %v1070_v19, %s2604_s26  ;;  %s2549_s26 = scalar_lea.hbm %s3691_s5, 128 }
  0xfd   : > { %p2551_p4 = scmp.lt.s32.totalorder %s2549_s26, %s2545_s10 }
  0xfe   : > { %v1225_v32 = vpop.permute.xlu1 %1224 }
  0xff   : > { %v1380_v35 = vsel %vm1377_vm15, %v1371_v34, %v1225_v32  ;;  %v1229_v45 = vpop.permute.xlu2 %1228  ;;  %v1627_v32 = vld [vmem:[#allocation4 + $0x1e8] sm:$0xff]  ;;  %v1592_v34 = vld [vmem:[#allocation4 + $0xd0] sm:$0xff]  ;;  %p2552_p7 = por %p2551_p4, %p2550_p3 }
 0x100   : > { %v1389_v37 = vsel %vm1386_vm1, %v1380_v35, %v1252_v58  ;;  %1923 = vmatpush.msrb.mxu0 %v1627_v32  ;;  %v1609_v35 = vld [vmem:[#allocation4 + $0x158] sm:$0xff]  ;;  %1763 = vmatpush.msra.mxu1 %v1592_v34 }
 0x101   : > { %v1199_v36 = vpop.permute.xlu0 %1198  ;;  %v1398_v38 = vsel %vm1395_vm2, %v1389_v37, %v1277_v18  ;;  %v1612_v18 = vld [vmem:[#allocation4 + $0x170] sm:$0xff]  ;;  %2404 = vmatpush.msra.mxu2 %v1592_v34  ;;  %v1645_v34 = vld [vmem:[#allocation4 + $0x278] sm:$0xff]  ;;  %p2553_p8 = pnand %p2552_p7, %p2548_p2 }
 0x102   : > { %1873 = vmatpush.msrb.mxu3 %v1612_v18  ;;  %v1608_v37 = vld [vmem:[#allocation4 + $0x150] sm:$0xff] }
 0x106   : > { %v1305_v39 = vpop.permute.xlu1 %1304 }
 0x107   : > { %v1407_v41 = vsel %vm1404_vm5, %v1398_v38, %v1305_v39  ;;  %v1307_v47 = vpop.permute.xlu2 %1306  ;;  %v1625_v38 = vld [vmem:[#allocation4 + $0x1d8] sm:$0xff] }
 0x108   : > { %v1416_v44 = vsel %vm1413_vm7, %v1407_v41, %v1332_v22  ;;  %v1590_v41 = vld [vmem:[#allocation4 + $0xc0] sm:$0xff] }
 0x109   : > { %2381 = vmatmul.msk.f32.gmra.mxu0 %vm1426_vm6, %v1416_v44  ;;  %v1201_v43 = vpop.permute.xlu0 %1200 }
 0x10e   : > { %v1174_v46 = vpop.permute.xlu1 %1173 }
 0x10f   : > { %v1309_v9 = vpop.permute.xlu2 %1308  ;;  %v1363_v40 = vsel %vm1359_vm13, %v1354_v54, %v1174_v46  ;;  %v1623_v54 = vld [vmem:[#allocation4 + $0x1c8] sm:$0xff] }
 0x110   : > { %v1372_v59 = vsel %vm1368_vm14, %v1363_v40, %v1199_v36  ;;  %v1626_v36 = vld [vmem:[#allocation4 + $0x1e0] sm:$0xff]  ;;  %v1587_v40 = vld [vmem:[#allocation4 + $0xa8] sm:$0xff] }
 0x111   : > { %v1279_v33 = vpop.permute.xlu0 %1278  ;;  %v1381_v17 = vsel %vm1377_vm15, %v1372_v59, %v1227_v8  ;;  %v1591_v8 = vld [vmem:[#allocation4 + $0xc8] sm:$0xff]  ;;  %1924 = vmatpush.msrb.mxu0 %v1626_v36  ;;  %v1586_v59 = vld [vmem:[#allocation4 + $0xa0] sm:$0xff]  ;;  %v1644_v36 = vld [vmem:[#allocation4 + $0x270] sm:$0xff] }
 0x112   : > { %1764 = vmatpush.msra.mxu1 %v1591_v8  ;;  %2405 = vmatpush.msra.mxu2 %v1591_v8 }
 0x113   : > { %1925 = vmatpush.msrb.mxu0 %v1625_v38 }
 0x114   : > { %1765 = vmatpush.msra.mxu1 %v1590_v41  ;;  %2406 = vmatpush.msra.mxu2 %v1590_v41 }
 0x116   : > { %v1176_v50 = vpop.permute.xlu1 %1175 }
 0x117   : > { %v1364_v56 = vsel %vm1359_vm13, %v1355_v0, %v1176_v50  ;;  %v1178_v2 = vpop.permute.xlu2 %1177 }
 0x118   : > { %v1373_v19 = vsel %vm1368_vm14, %v1364_v56, %v1201_v43  ;;  %v1622_v56 = vld [vmem:[#allocation4 + $0x1c0] sm:$0xff] }
 0x119   : > { %v1281_v51 = vpop.permute.xlu0 %1280  ;;  %v1382_v60 = vsel %vm1377_vm15, %v1373_v19, %v1229_v45  ;;  %v1621_v19 = vld [vmem:[#allocation4 + $0x1b8] sm:$0xff] }
 0x11e   : > { %v1254_v55 = vpop.permute.xlu1 %1253 }
 0x11f   : > { %v1390_v49 = vsel %vm1386_vm1, %v1381_v17, %v1254_v55  ;;  %v1258_v10 = vpop.permute.xlu2 %1257  ;;  %v1588_v55 = vld [vmem:[#allocation4 + $0xb0] sm:$0xff]  ;;  %v1603_v17 = vld [vmem:[#allocation4 + $0x128] sm:$0xff] }
 0x120   : > { %v1399_v5 = vsel %vm1395_vm2, %v1390_v49, %v1279_v33  ;;  %v1607_v33 = vld [vmem:[#allocation4 + $0x148] sm:$0xff]  ;;  %v1585_v49 = vld [vmem:[#allocation4 + $0x98] sm:$0xff] }
 0x121   : > { %v1336_v58 = vpop.permute.xlu0 %1335  ;;  %v1408_v42 = vsel %vm1404_vm5, %v1399_v5, %v1307_v47  ;;  %v1624_v47 = vld [vmem:[#allocation4 + $0x1d0] sm:$0xff] }
 0x122   : > { %1926 = vmatpush.msrb.mxu0 %v1624_v47  ;;  %v1584_v5 = vld [vmem:[#allocation4 + $0x90] sm:$0xff] }
 0x124   : > { %1927 = vmatpush.msrb.mxu0 %v1623_v54 }
 0x126   : > { %v1256_v1 = vpop.permute.xlu1 %1255  ;;  %1928 = vmatpush.msrb.mxu0 %v1622_v56  ;;  %v1637_v56 = vld [vmem:[#allocation4 + $0x238] sm:$0xff] }
 0x127   : > { %v1391_v6 = vsel %vm1386_vm1, %v1382_v60, %v1256_v1  ;;  %v1338_v21 = vpop.permute.xlu2 %1337 }
 0x128   : > { %v1400_v61 = vsel %vm1395_vm2, %v1391_v6, %v1281_v51  ;;  %v1589_v51 = vld [vmem:[#allocation4 + $0xb8] sm:$0xff]  ;;  %1929 = vmatpush.msrb.mxu0 %v1621_v19  ;;  %v1620_v6 = vld [vmem:[#allocation4 + $0x1b0] sm:$0xff] }
 0x129   : > { %v1409_v3 = vsel %vm1404_vm5, %v1400_v61, %v1309_v9  ;;  %v1203_v4 = vpop.permute.xlu0 %1202  ;;  %1766 = vmatpush.msra.mxu1 %v1589_v51  ;;  %v1605_v9 = vld [vmem:[#allocation4 + $0x138] sm:$0xff]  ;;  %2407 = vmatpush.msra.mxu2 %v1589_v51 }
 0x12a   : > { %v1418_v48 = vsel %vm1413_vm7, %v1409_v3, %v1336_v58  ;;  %v1604_v58 = vld [vmem:[#allocation4 + $0x130] sm:$0xff]  ;;  %1930 = vmatpush.msrb.mxu0 %v1620_v6  ;;  %v1602_v3 = vld [vmem:[#allocation4 + $0x120] sm:$0xff] }
 0x12b   : > { %2383 = vmatmul.msk.f32.vlgmr.msra.gmra.mxu3 %vm1426_vm6, %v1418_v48  ;;  %1767 = vmatpush.msra.mxu1 %v1588_v55 }
 0x12c   : > { %2408 = vmatpush.msra.mxu2 %v1588_v55 }
 0x12d   : > { %1768 = vmatpush.msra.mxu1 %v1587_v40 }
 0x12e   : > { %v1334_v57 = vpop.permute.xlu1 %1333  ;;  %2409 = vmatpush.msra.mxu2 %v1587_v40 }
 0x12f   : > { %v1417_v7 = vsel %vm1413_vm7, %v1408_v42, %v1334_v57  ;;  %v3263_v44 = vpop.permute.xlu2 %1204  ;;  %1769 = vmatpush.msra.mxu1 %v1586_v59  ;;  %v1618_v42 = vld [vmem:[#allocation4 + $0x1a0] sm:$0xff]  ;;  %v1583_v57 = vld [vmem:[#allocation4 + $0x88] sm:$0xff] }
 0x130   : > { %2382 = vmatmul.msk.f32.gmra.mxu0 %vm1426_vm6, %v1417_v7  ;;  %2410 = vmatpush.msra.mxu2 %v1586_v59  ;;  %v3275_v7 = vld [vmem:[#allocation3] sm:$0xff]  ;;  %v1636_v59 = vld [vmem:[#allocation4 + $0x230] sm:$0xff] }
 0x131   : > { %v1283_v22 = vpop.permute.xlu0 %1282  ;;  %1770 = vmatpush.msra.mxu1 %v1585_v49 }
 0x132   : > { %2411 = vmatpush.msra.mxu2 %v1585_v49 }
 0x133   : > { %1771 = vmatpush.msra.mxu1 %v1584_v5 }
 0x134   : > { %2412 = vmatpush.msra.mxu2 %v1584_v5  ;;  %v1633_v5 = vld [vmem:[#allocation4 + $0x218] sm:$0xff] }
 0x135   : > { %1772 = vmatpush.msra.mxu1 %v1583_v57 }
 0x136   : > { %v1129_v11 = vpop.permute.xlu1 %1128  ;;  %2413 = vmatpush.msra.mxu2 %v1583_v57  ;;  %v1631_v57 = vld [vmem:[#allocation4 + $0x208] sm:$0xff] }
 0x137   : > { %v1356_v13 = vsel %vm272_vm0, %v3016_v63, %v1129_v11  ;;  %v1611_v63 = vld [vmem:[#allocation4 + $0x168] sm:$0xff]  ;;  %v1600_v11 = vld [vmem:[#allocation4 + $0x110] sm:$0xff]  ;;  %1773 = vmatpush.msra.mxu1 %v1582_v15 }
 0x138   : > { %v1365_v24 = vsel %vm1359_vm13, %v1356_v13, %v1178_v2  ;;  %1874 = vmatpush.msrb.mxu3 %v1611_v63  ;;  %v1285_v2 = vpop.permute.xlu2 %1284  ;;  %v1726_v13 = vrot.slane %v3275_v7, 1  ;;  %2414 = vmatpush.msra.mxu2 %v1582_v15  ;;  %v1630_v15 = vld [vmem:[#allocation4 + $0x200] sm:$0xff] }
 0x139   : > { %v3258_v20 = vpop.permute.xlu0 %1130  ;;  %v1374_v29 = vsel %vm1368_vm14, %v1365_v24, %v1203_v4  ;;  %v1619_v4 = vld [vmem:[#allocation4 + $0x1a8] sm:$0xff]  ;;  %1976 = vmatpush.msrb.mxu1 %v1645_v34 }
 0x13a   : > { %1875 = vmatpush.msrb.mxu3 %v1610_v31  ;;  %v1357_v60 = vsel %vm272_vm0, %v3055_v62, %v3258_v20  ;;  %1931 = vmatpush.msrb.mxu0 %v1619_v4  ;;  %v1601_v62 = vld [vmem:[#allocation4 + $0x118] sm:$0xff]  ;;  %v1598_v20 = vld [vmem:[#allocation4 + $0x100] sm:$0xff] }
 0x13b   : > { %1977 = vmatpush.msrb.mxu1 %v1644_v36 }
 0x13c   : > { %1876 = vmatpush.msrb.mxu3 %v1609_v35  ;;  %1932 = vmatpush.msrb.mxu0 %v1618_v42 }
 0x13e   : > { %v1231_v25 = vpop.permute.xlu1 %1230  ;;  %1877 = vmatpush.msrb.mxu3 %v1608_v37  ;;  %1933 = vmatpush.msrb.mxu0 %v1617_v12 }
 0x13f   : > { %v1383_v30 = vsel %vm1377_vm15, %v1374_v29, %v1231_v25  ;;  %v1615_v25 = vld [vmem:[#allocation4 + $0x188] sm:$0xff] }
 0x140   : > { %v1392_v39 = vsel %vm1386_vm1, %v1383_v30, %v1258_v10  ;;  %1878 = vmatpush.msrb.mxu3 %v1607_v33  ;;  %v3277_v10 = vld [vmem:[#allocation3 + $0x8] sm:$0x3]  ;;  %v1133_v63 = vpop.permute.xlu2 %1132  ;;  %v1640_v33 = vld [vmem:[#allocation4 + $0x250] sm:$0xff] }
 0x141   : > { %v1401_v43 = vsel %vm1395_vm2, %v1392_v39, %v1283_v22  ;;  %v3266_v46 = vpop.permute.xlu0 %1232  ;;  %v1727_v26 = vrot.slane %v3277_v10, 1  ;;  %v1358_v35 = vsel %vm272_vm0, %v3120_v53, %v1133_v63  ;;  %v1643_v39 = vld [vmem:[#allocation4 + $0x268] sm:$0xff]  ;;  %v3299_v53 = vld [vmem:[%s3688_s2] ss:$0 sm:$0xff]  ;;  %v1841_v6 = vrot.slane %v3277_v10, 2 }
 0x142   : > { %1879 = vmatpush.msrb.mxu3 %v1606_v52  ;;  %1978 = vmatpush.msrb.mxu1 %v1643_v39  ;;  %v1638_v52 = vld [vmem:[#allocation4 + $0x240] sm:$0xff] }
 0x143   : > { %v1728_v18 = vsel %vm1093_vm3, %v1726_v13, %v1727_v26 }
 0x144   : > { %1880 = vmatpush.msrb.mxu3 %v1605_v9  ;;  %1774 = vmatmul.f32.vlgmr.msra.gmra.mxu1 %v1728_v18 }
 0x146   : > { %v1311_v45 = vpop.permute.xlu1 %1310  ;;  %1881 = vmatpush.msrb.mxu3 %v1604_v58 }
 0x147   : > { %v1410_v50 = vsel %vm1404_vm5, %v1401_v43, %v1311_v45  ;;  %v1641_v45 = vld [vmem:[#allocation4 + $0x258] sm:$0xff] }
 0x148   : > { %v1419_v0 = vsel %vm1413_vm7, %v1410_v50, %v1338_v21  ;;  %1882 = vmatpush.msrb.mxu3 %v1603_v17  ;;  %v1616_v21 = vld [vmem:[#allocation4 + $0x190] sm:$0xff]  ;;  %v1235_v8 = vpop.permute.xlu2 %1234  ;;  %v1639_v50 = vld [vmem:[#allocation4 + $0x248] sm:$0xff]  ;;  %v1840_v17 = vrot.slane %v3275_v7, 2 }
 0x149   : > { %2384 = vmatmul.msk.f32.gmra.mxu3 %vm1426_vm6, %v1419_v0  ;;  %v1313_v61 = vpop.permute.xlu0 %1312  ;;  %1934 = vmatpush.msrb.mxu0 %v1616_v21 }
 0x14a   : > { %1883 = vmatpush.msrb.mxu3 %v1602_v3  ;;  %v1842_v4 = vsel %vm1142_vm4, %v1840_v17, %v1841_v6  ;;  %v1580_v17 = vld [vmem:[#allocation4 + $0x70] sm:$0xff] }
 0x14b   : > { %1935 = vmatpush.msrb.mxu0 %v1615_v25  ;;  %v1676_v6 = vld [vmem:[#allocation4 + $0x370] sm:$0xff] }
 0x14c   : > { %1884 = vmatpush.msrb.mxu3 %v1601_v62  ;;  %v1632_v62 = vld [vmem:[#allocation4 + $0x210] sm:$0xff] }
 0x14d   : > { %1936 = vmatpush.msrb.mxu0 %v1614_v28 }
 0x14e   : > { %v1180_v1 = vpop.permute.xlu1 %1179  ;;  %1885 = vmatpush.msrb.mxu3 %v1600_v11 }
 0x14f   : > { %v1366_v48 = vsel %vm1359_vm13, %v1357_v60, %v1180_v1 }
 0x150   : > { %v1375_v22 = vsel %vm1368_vm14, %v1366_v48, %v3263_v44  ;;  %1886 = vmatpush.msrb.mxu3 %v1599_v14  ;;  %v1642_v44 = vld [vmem:[#allocation4 + $0x260] sm:$0xff]  ;;  %v1315_v0 = vpop.permute.xlu2 %1314 }
 0x151   : > { %v1384_v23 = vsel %vm1377_vm15, %v1375_v22, %v3266_v46  ;;  %v1182_v27 = vpop.permute.xlu0 %1181  ;;  %1979 = vmatpush.msrb.mxu1 %v1642_v44 }
 0x152   : > { %1887 = vmatpush.msrb.mxu3 %v1598_v20  ;;  %v1367_v37 = vsel %vm1359_vm13, %v1358_v35, %v1182_v27 }
 0x153   : > { %1980 = vmatpush.msrb.mxu1 %v1641_v45 }
 0x155   : > { %1981 = vmatpush.msrb.mxu1 %v1640_v33 }
 0x156   : > { %v1260_v16 = vpop.permute.xlu1 %1259 }
 0x157   : > { %v1393_v24 = vsel %vm1386_vm1, %v1384_v23, %v1260_v16  ;;  %1982 = vmatpush.msrb.mxu1 %v1639_v50 }
 0x158   : > { %v1402_v29 = vsel %vm1395_vm2, %v1393_v24, %v1285_v2  ;;  %v1635_v2 = vld [vmem:[#allocation4 + $0x228] sm:$0xff] }
 0x159   : > { %v1411_v30 = vsel %vm1404_vm5, %v1402_v29, %v1313_v61  ;;  %v1262_v38 = vpop.permute.xlu0 %1261  ;;  %1983 = vmatpush.msrb.mxu1 %v1638_v52  ;;  %v1634_v61 = vld [vmem:[#allocation4 + $0x220] sm:$0xff]  ;;  %v1581_v52 = vld [vmem:[#allocation4 + $0x78] sm:$0xff] }
 0x15a   : > { %1799 = vmatpush.msrb.mxu2 %v1581_v52  ;;  %v1666_v52 = vld [vmem:[#allocation4 + $0x320] sm:$0xff] }
 0x15b   : > { %1984 = vmatpush.msrb.mxu1 %v1637_v56 }
 0x15c   : > { %1800 = vmatpush.msrb.mxu2 %v1580_v17  ;;  %v1664_v17 = vld [vmem:[#allocation4 + $0x310] sm:$0xff] }
 0x15d   : > { %1985 = vmatpush.msrb.mxu1 %v1636_v59  ;;  %v1677_v59 = vld [vmem:[#allocation4 + $0x378] sm:$0xff] }
 0x15e   : > { %v1340_v31 = vpop.permute.xlu1 %1339  ;;  %2078 = vmatpush.msra.mxu3 %v1677_v59  ;;  %v1688_v59 = vld [vmem:[#allocation4 + $0x3d0] sm:$0xff] }
 0x15f   : > { %v1420_v32 = vsel %vm1413_vm7, %v1411_v30, %v1340_v31  ;;  %1986 = vmatpush.msrb.mxu1 %v1635_v2  ;;  %v1579_v2 = vld [vmem:[#allocation4 + $0x68] sm:$0xff] }
 0x160   : > { %2385 = vmatmul.msk.f32.gmra.mxu3 %vm1426_vm6, %v1420_v32  ;;  %1801 = vmatpush.msrb.mxu2 %v1579_v2  ;;  %v1687_v2 = vld [vmem:[#allocation4 + $0x3c8] sm:$0xff] }
 0x161   : > { %v1342_v9 = vpop.permute.xlu0 %1341  ;;  %1987 = vmatpush.msrb.mxu1 %v1634_v61  ;;  %2079 = vmatpush.msra.mxu3 %v1676_v6  ;;  %v3411_v6 = vld [vmem:[#allocation4 + $0x458] sm:$0xff] }
 0x163   : > { %1988 = vmatpush.msrb.mxu1 %v1633_v5  ;;  %v1578_v5 = vld [vmem:[#allocation4 + $0x60] sm:$0xff] }
 0x164   : > { %1802 = vmatpush.msrb.mxu2 %v1578_v5 }
 0x165   : > { %1989 = vmatpush.msrb.mxu1 %v1632_v62  ;;  %v1674_v62 = vld [vmem:[#allocation4 + $0x360] sm:$0xff] }
 0x166   : > { %v1207_v41 = vpop.permute.xlu1 %1206 }
 0x167   : > { %v1376_v43 = vsel %vm1368_vm14, %v1367_v37, %v1207_v41  ;;  %1990 = vmatpush.msrb.mxu1 %v1631_v57 }
 0x168   : > { %v1385_v46 = vsel %vm1377_vm15, %v1376_v43, %v1235_v8 }
 0x169   : > { %v1394_v47 = vsel %vm1386_vm1, %v1385_v46, %v1262_v38  ;;  %1991 = vmatpush.msrb.mxu1 %v1630_v15  ;;  %v1575_v15 = vld [vmem:[#allocation4 + $0x48] sm:$0xff] }
 0x16c   : > { %v1472_v51 = vpop.f32.mrf.mxu0 }
 0x16d   : > { %v1473_v54 = vadd.f32 %v3299_v53, %v1472_v51 }
 0x16e   : > { %v1287_v55 = vpop.permute.xlu1 %1286 }
 0x16f   : > { %v1403_v40 = vsel %vm1395_vm2, %v1394_v47, %v1287_v55  ;;  %v1496_v58 = vmul.f32 0.01, %v1473_v54 }
 0x170   : > { %v1412_v19 = vsel %vm1404_vm5, %v1403_v40, %v1315_v0 }
 0x171   : > { %v1421_v60 = vsel %vm1413_vm7, %v1412_v19, %v1342_v9  ;;  %v3306_v1 = vmax.f32 %v1473_v54, %v1496_v58 }
 0x172   : > { %2386 = vmatmul.msk.f32.gmra.mxu3 %vm1426_vm6, %v1421_v60 }
 0x173   : > { %1538 = vst [vmem:[#allocation3 + $0x11] sm:$0xff] %v3306_v1 }
 0x174   : > { %v1475_v49 = vpop.f32.mrf.mxu0 }
 0x175   : > { %v1476_v3 = vadd.f32 %v3299_v53, %v1475_v49  ;;  %v1675_v49 = vld [vmem:[#allocation4 + $0x368] sm:$0xff] }
 0x176   : > { %2080 = vmatpush.msra.mxu3 %v1675_v49 }
 0x177   : > { %v1497_v48 = vmul.f32 0.01, %v1476_v3 }
 0x178   : > { %2081 = vmatpush.msra.mxu3 %v1674_v62 }
 0x179   : > { %v3314_v42 = vmax.f32 %v1476_v3, %v1497_v48 }
 0x17a   : > { %1888 = vmatmul.f32.vlgmr.msrb.gmra.mxu3 %v1842_v4  ;;  %v3316_v10 = vld [vmem:[#allocation3 + $0x10] sm:$0xff]  ;;  %v1549_v22 = vld [vmem:[#allocation3 + $0x18] sm:$0x3] }
 0x17b   : > { %1539 = vst [vmem:[#allocation3 + $0x21] sm:$0xff] %v3314_v42  ;;  %1937 = vmatmul.f32.vlgmr.msrb.gmra.mxu0 %v3316_v10  ;;  %v1729_v11 = vrot.slane %v3316_v10, 1  ;;  %v1730_v12 = vrot.slane %v1549_v22, 1  ;;  %v1843_v13 = vrot.slane %v3316_v10, 2  ;;  %v1844_v26 = vrot.slane %v1549_v22, 2 }
 0x17d   : > { %v1731_v16 = vsel %vm1093_vm3, %v1729_v11, %v1730_v12  ;;  %v3324_v18 = vsel %vm1142_vm4, %v1843_v13, %v1844_v26  ;;  %v1577_v11 = vld [vmem:[#allocation4 + $0x58] sm:$0xff]  ;;  %v1576_v13 = vld [vmem:[#allocation4 + $0x50] sm:$0xff] }
 0x17e   : > { %1777 = vmatmul.f32.gmra.mxu1 %v1731_v16  ;;  %v1673_v12 = vld [vmem:[#allocation4 + $0x358] sm:$0xff]  ;;  %1803 = vmatpush.msrb.mxu2 %v1577_v11  ;;  %v1672_v26 = vld [vmem:[#allocation4 + $0x350] sm:$0xff]  ;;  %v1663_v11 = vld [vmem:[#allocation4 + $0x308] sm:$0xff] }
 0x17f   : > { %2082 = vmatpush.msra.mxu3 %v1673_v12  ;;  %v3419_v12 = vld [vmem:[#allocation4 + $0x450] sm:$0xff] }
 0x180   : > { %1804 = vmatpush.msrb.mxu2 %v1576_v13  ;;  %v1566_v13 = vld [vmem:[#allocation4] sm:$0xff] }
 0x181   : > { %2083 = vmatpush.msra.mxu3 %v1672_v26  ;;  %v1686_v26 = vld [vmem:[#allocation4 + $0x3c0] sm:$0xff] }
 0x182   : > { %1891 = vmatmul.f32.gmra.mxu3 %v3324_v18  ;;  %v3327_v14 = vld [vmem:[#allocation3 + $0x20] sm:$0xff]  ;;  %v1551_v21 = vld [vmem:[#allocation3 + $0x28] sm:$0x3]  ;;  %1805 = vmatpush.msrb.mxu2 %v1575_v15 }
 0x183   : > { %1940 = vmatmul.f32.gmra.mxu0 %v3327_v14  ;;  %v1732_v23 = vrot.slane %v3327_v14, 1  ;;  %v1733_v24 = vrot.slane %v1551_v21, 1  ;;  %v1846_v20 = vrot.slane %v3327_v14, 2  ;;  %v1847_v25 = vrot.slane %v1551_v21, 2  ;;  %v1574_v21 = vld [vmem:[#allocation4 + $0x40] sm:$0xff] }
 0x184   : > { %1806 = vmatpush.msrb.mxu2 %v1574_v21  ;;  %v1662_v21 = vld [vmem:[#allocation4 + $0x300] sm:$0xff] }
 0x185   : > { %v3333_v27 = vsel %vm1093_vm3, %v1732_v23, %v1733_v24  ;;  %v3338_v30 = vsel %vm1142_vm4, %v1846_v20, %v1847_v25  ;;  %v1693_v23 = vld [vmem:[#allocation4 + $0x3f8] sm:$0xff]  ;;  %v1670_v20 = vld [vmem:[#allocation4 + $0x340] sm:$0xff]  ;;  %v1692_v25 = vld [vmem:[#allocation4 + $0x3f0] sm:$0xff] }
 0x186   : > { %v1478_v63 = vpop.f32.mrf.mxu0  ;;  %1780 = vmatmul.f32.gmra.mxu1 %v3333_v27  ;;  %2133 = vmatpush.msra.mxu0 %v1693_v23  ;;  %v3428_v23 = vld [vmem:[#allocation4 + $0x448] sm:$0xff] }
 0x187   : > { %v1479_v28 = vadd.f32 %v3299_v53, %v1478_v63 }
 0x188   : > { %2134 = vmatpush.msra.mxu0 %v1692_v25  ;;  %v3433_v25 = vld [vmem:[#allocation4 + $0x440] sm:$0xff] }
 0x189   : > { %v1498_v29 = vmul.f32 0.01, %v1479_v28 }
 0x18a   : > { %1894 = vmatmul.f32.gmra.mxu3 %v3338_v30 }
 0x18b   : > { %v3341_v31 = vmax.f32 %v1479_v28, %v1498_v29  ;;  %v1573_v28 = vld [vmem:[#allocation4 + $0x38] sm:$0xff] }
 0x18c   : > { %v3396_v29 = vld [vmem:[#allocation4 + $0x478] sm:$0xff]  ;;  %1807 = vmatpush.msrb.mxu2 %v1573_v28 }
 0x18d   : > { %1540 = vst [vmem:[#allocation3 + $0x31] sm:$0xff] %v3341_v31  ;;  %2415 = vmatpush.msra.mxu1 %v3396_v29  ;;  %v3436_v28 = vld [vmem:[#allocation4 + $0x438] sm:$0xff] }
 0x194   : > { %v3344_v32 = vld [vmem:[#allocation3 + $0x30] sm:$0xff]  ;;  %v1553_v34 = vld [vmem:[#allocation3 + $0x38] sm:$0x3] }
 0x195   : > { %1943 = vmatmul.f32.gmra.mxu0 %v3344_v32  ;;  %v1735_v35 = vrot.slane %v3344_v32, 1  ;;  %v1736_v36 = vrot.slane %v1553_v34, 1  ;;  %v1849_v8 = vrot.slane %v3344_v32, 2  ;;  %v1850_v37 = vrot.slane %v1553_v34, 2  ;;  %v1669_v34 = vld [vmem:[#allocation4 + $0x338] sm:$0xff] }
 0x197   : > { %v3350_v38 = vsel %vm1093_vm3, %v1735_v35, %v1736_v36  ;;  %v3353_v39 = vsel %vm1142_vm4, %v1849_v8, %v1850_v37  ;;  %v1691_v35 = vld [vmem:[#allocation4 + $0x3e8] sm:$0xff]  ;;  %v1572_v8 = vld [vmem:[#allocation4 + $0x30] sm:$0xff] }
 0x198   : > { %1783 = vmatmul.f32.gmra.mxu1 %v3350_v38  ;;  %1897 = vmatmul.f32.gmra.mxu3 %v3353_v39  ;;  %v1668_v37 = vld [vmem:[#allocation4 + $0x330] sm:$0xff] }
 0x199   : > { %2135 = vmatpush.msra.mxu0 %v1691_v35  ;;  %1808 = vmatpush.msrb.mxu2 %v1572_v8  ;;  %v1683_v35 = vld [vmem:[#allocation4 + $0x3a8] sm:$0xff]  ;;  %v3439_v8 = vld [vmem:[#allocation4 + $0x430] sm:$0xff] }
 0x1a0   : > { %1992 = vmatmul.f32.vlgmr.msrb.gmra.mxu1 %v1731_v16  ;;  %v1671_v16 = vld [vmem:[#allocation4 + $0x348] sm:$0xff] }
 0x1a1   : > { %2084 = vmatpush.msra.mxu3 %v1671_v16 }
 0x1a3   : > { %2085 = vmatpush.msra.mxu3 %v1670_v20  ;;  %v1685_v20 = vld [vmem:[#allocation4 + $0x3b8] sm:$0xff] }
 0x1a5   : > { %2086 = vmatpush.msra.mxu3 %v1669_v34  ;;  %v1660_v34 = vld [vmem:[#allocation4 + $0x2f0] sm:$0xff] }
 0x1a7   : > { %2087 = vmatpush.msra.mxu3 %v1668_v37 }
 0x1a8   : > { %1995 = vmatmul.f32.gmra.mxu1 %v3333_v27 }
 0x1ad   : > { %v1481_v41 = vpop.f32.mrf.mxu0 }
 0x1ae   : > { %v1482_v44 = vadd.f32 %v3299_v53, %v1481_v41  ;;  %v1484_v43 = vpop.f32.mrf.mxu3 }
 0x1af   : > { %v1485_v45 = vadd.f32 %v3299_v53, %v1484_v43  ;;  %v1667_v43 = vld [vmem:[#allocation4 + $0x328] sm:$0xff] }
 0x1b0   : > { %v1499_v46 = vmul.f32 0.01, %v1482_v44  ;;  %1998 = vmatmul.f32.gmra.mxu1 %v3350_v38  ;;  %2088 = vmatpush.msra.mxu3 %v1667_v43  ;;  %v3443_v43 = vld [vmem:[#allocation4 + $0x428] sm:$0xff] }
 0x1b1   : > { %v1500_v33 = vmul.f32 0.01, %v1485_v45 }
 0x1b2   : > { %v3361_v47 = vmax.f32 %v1482_v44, %v1499_v46  ;;  %v1571_v44 = vld [vmem:[#allocation4 + $0x28] sm:$0xff]  ;;  %v1570_v46 = vld [vmem:[#allocation4 + $0x20] sm:$0xff]  ;;  %2089 = vmatpush.msra.mxu3 %v1666_v52  ;;  %v1681_v52 = vld [vmem:[#allocation4 + $0x398] sm:$0xff] }
 0x1b3   : > { %v3363_v50 = vmax.f32 %v1485_v45, %v1500_v33  ;;  %v3401_v45 = vld [vmem:[#allocation4 + $0x470] sm:$0xff]  ;;  %v1690_v33 = vld [vmem:[#allocation4 + $0x3e0] sm:$0xff]  ;;  %1809 = vmatpush.msrb.mxu2 %v1571_v44 }
 0x1b4   : > { %1541 = vst [vmem:[#allocation3 + $0x41] sm:$0xff] %v3361_v47  ;;  %2416 = vmatpush.msra.mxu1 %v3401_v45  ;;  %2136 = vmatpush.msra.mxu0 %v1690_v33  ;;  %v1682_v44 = vld [vmem:[#allocation4 + $0x3a0] sm:$0xff] }
 0x1b5   : > { %1542 = vst [vmem:[#allocation3 + $0x51] sm:$0xff] %v3363_v50  ;;  %1810 = vmatpush.msrb.mxu2 %v1570_v46  ;;  %v1659_v46 = vld [vmem:[#allocation4 + $0x2e8] sm:$0xff] }
 0x1bb   : > { %v3367_v51 = vld [vmem:[#allocation3 + $0x40] sm:$0xff]  ;;  %v1555_v0 = vld [vmem:[#allocation3 + $0x48] sm:$0x3] }
 0x1bc   : > { %1946 = vmatmul.f32.gmra.mxu0 %v3367_v51  ;;  %v1738_v54 = vrot.slane %v3367_v51, 1  ;;  %v1739_v55 = vrot.slane %v1555_v0, 1  ;;  %v1852_v9 = vrot.slane %v3367_v51, 2  ;;  %v1853_v56 = vrot.slane %v1555_v0, 2  ;;  %v3378_v19 = vld [vmem:[#allocation3 + $0x50] sm:$0xff]  ;;  %v3405_v0 = vld [vmem:[#allocation4 + $0x468] sm:$0xff] }
 0x1bd   : > { %v1557_v60 = vld [vmem:[#allocation3 + $0x58] sm:$0x3]  ;;  %v1741_v61 = vrot.slane %v3378_v19, 1  ;;  %v1855_v4 = vrot.slane %v3378_v19, 2  ;;  %2417 = vmatpush.msra.mxu1 %v3405_v0 }
 0x1be   : > { %v3373_v40 = vsel %vm1093_vm3, %v1738_v54, %v1739_v55  ;;  %v3376_v58 = vsel %vm1142_vm4, %v1852_v9, %v1853_v56  ;;  %v1742_v3 = vrot.slane %v1557_v60, 1  ;;  %v1856_v48 = vrot.slane %v1557_v60, 2  ;;  %v1689_v54 = vld [vmem:[#allocation4 + $0x3d8] sm:$0xff]  ;;  %v3408_v56 = vld [vmem:[#allocation4 + $0x460] sm:$0xff]  ;;  %v1568_v60 = vld [vmem:[#allocation4 + $0x10] sm:$0xff] }
 0x1bf   : > { %1786 = vmatmul.f32.vlgmr.msra.gmra.mxu2 %v3373_v40  ;;  %1900 = vmatmul.f32.gmra.mxu3 %v3376_v58  ;;  %v1569_v55 = vld [vmem:[#allocation4 + $0x18] sm:$0xff] }
 0x1c0   : > { %2001 = vmatmul.f32.gmra.mxu1 %v3373_v40  ;;  %v3387_v57 = vsel %vm1093_vm3, %v1741_v61, %v1742_v3  ;;  %v3390_v22 = vsel %vm1142_vm4, %v1855_v4, %v1856_v48  ;;  %2137 = vmatpush.msra.mxu0 %v1689_v54  ;;  %v1665_v9 = vld [vmem:[#allocation4 + $0x318] sm:$0xff]  ;;  %v1567_v3 = vld [vmem:[#allocation4 + $0x8] sm:$0xff]  ;;  %v3446_v54 = vld [vmem:[#allocation4 + $0x420] sm:$0xff] }
 0x1c1   : > { %2418 = vmatpush.msra.mxu1 %v3408_v56  ;;  %1811 = vmatpush.msrb.mxu2 %v1569_v55  ;;  %v1658_v55 = vld [vmem:[#allocation4 + $0x2e0] sm:$0xff] }
 0x1c2   : > { %2138 = vmatpush.msra.mxu0 %v1688_v59  ;;  %2090 = vmatpush.msra.mxu3 %v1665_v9  ;;  %v1680_v59 = vld [vmem:[#allocation4 + $0x390] sm:$0xff] }
 0x1c3   : > { %2419 = vmatpush.msra.mxu1 %v3411_v6  ;;  %1812 = vmatpush.msrb.mxu2 %v1568_v60  ;;  %v3451_v60 = vld [vmem:[#allocation4 + $0x418] sm:$0xff] }
 0x1c4   : > { %1949 = vmatmul.f32.gmra.mxu0 %v3378_v19  ;;  %2091 = vmatpush.msra.mxu3 %v1664_v17  ;;  %v1679_v17 = vld [vmem:[#allocation4 + $0x388] sm:$0xff] }
 0x1c5   : > { %2139 = vmatpush.msra.mxu0 %v1687_v2  ;;  %1813 = vmatpush.msrb.mxu2 %v1567_v3  ;;  %v3455_v2 = vld [vmem:[#allocation4 + $0x410] sm:$0xff]  ;;  %v3458_v3 = vld [vmem:[#allocation4 + $0x408] sm:$0xff] }
 0x1c6   : > { %2420 = vmatpush.msra.mxu1 %v3419_v12  ;;  %2092 = vmatpush.msra.mxu3 %v1663_v11 }
 0x1c7   : > { %1789 = vmatmul.f32.gmra.mxu2 %v3387_v57  ;;  %1903 = vmatmul.f32.gmra.mxu3 %v3390_v22 }
 0x1c8   : > { %2004 = vmatmul.f32.gmra.mxu1 %v3387_v57  ;;  %2140 = vmatpush.msra.mxu0 %v1686_v26 }
 0x1c9   : > { %1814 = vmatpush.msrb.mxu2 %v1566_v13  ;;  %2093 = vmatpush.msra.mxu3 %v1662_v21 }
 0x1ca   : > { %2421 = vmatpush.msra.mxu1 %v3428_v23  ;;  %2141 = vmatpush.msra.mxu0 %v1685_v20 }
 0x1cc   : > { %v1487_v24 = vpop.f32.mrf.mxu3  ;;  %2422 = vmatpush.msra.mxu1 %v3433_v25 }
 0x1cd   : > { %v1488_v63 = vadd.f32 %v3299_v53, %v1487_v24  ;;  %v1661_v24 = vld [vmem:[#allocation4 + $0x2f8] sm:$0xff] }
 0x1ce   : > { %2029 = vmatpush.msra.mxu2 %v1661_v24  ;;  %2423 = vmatpush.msra.mxu1 %v3436_v28 }
 0x1cf   : > { %v1501_v36 = vmul.f32 0.01, %v1488_v63 }
 0x1d0   : > { %2030 = vmatpush.msra.mxu2 %v1660_v34  ;;  %2424 = vmatpush.msra.mxu1 %v3439_v8 }
 0x1d1   : > { %v3399_v41 = vmax.f32 %v1488_v63, %v1501_v36  ;;  %v1684_v63 = vld [vmem:[#allocation4 + $0x3b0] sm:$0xff] }
 0x1d2   : > { %2142 = vmatpush.msra.mxu0 %v1684_v63  ;;  %2031 = vmatpush.msra.mxu2 %v1659_v46 }
 0x1d3   : > { %1543 = vst [vmem:[#allocation3 + $0x61] sm:$0xff] %v3399_v41  ;;  %2425 = vmatpush.msra.mxu1 %v3443_v43 }
 0x1d4   : > { %2143 = vmatpush.msra.mxu0 %v1683_v35  ;;  %2032 = vmatpush.msra.mxu2 %v1658_v55 }
 0x1d5   : > { %2426 = vmatpush.msra.mxu1 %v3446_v54 }
 0x1d6   : > { %2144 = vmatpush.msra.mxu0 %v1682_v44  ;;  %v1652_v44 = vld [vmem:[#allocation4 + $0x2b0] sm:$0xff] }
 0x1d7   : > { %2427 = vmatpush.msra.mxu1 %v3451_v60 }
 0x1d8   : > { %2145 = vmatpush.msra.mxu0 %v1681_v52 }
 0x1d9   : > { %2428 = vmatpush.msra.mxu1 %v3455_v2 }
 0x1da   : > { %v3414_v49 = vld [vmem:[#allocation3 + $0x60] sm:$0xff]  ;;  %v1559_v61 = vld [vmem:[#allocation3 + $0x68] sm:$0x3]  ;;  %2146 = vmatpush.msra.mxu0 %v1680_v59 }
 0x1db   : > { %1952 = vmatmul.f32.gmra.mxu0 %v3414_v49  ;;  %v1744_v4 = vrot.slane %v3414_v49, 1  ;;  %v1745_v48 = vrot.slane %v1559_v61, 1  ;;  %v1858_v5 = vrot.slane %v3414_v49, 2  ;;  %v1859_v62 = vrot.slane %v1559_v61, 2  ;;  %v1678_v61 = vld [vmem:[#allocation4 + $0x380] sm:$0xff]  ;;  %2429 = vmatpush.msra.mxu1 %v3458_v3 }
 0x1dc   : > { %2147 = vmatpush.msra.mxu0 %v1679_v17 }
 0x1dd   : > { %v3423_v15 = vsel %vm1093_vm3, %v1744_v4, %v1745_v48  ;;  %v3426_v16 = vsel %vm1142_vm4, %v1858_v5, %v1859_v62  ;;  %v1657_v4 = vld [vmem:[#allocation4 + $0x2d8] sm:$0xff]  ;;  %v3461_v48 = vld [vmem:[#allocation4 + $0x400] sm:$0xff]  ;;  %v1656_v5 = vld [vmem:[#allocation4 + $0x2d0] sm:$0xff] }
 0x1de   : > { %1792 = vmatmul.f32.gmra.mxu2 %v3423_v15  ;;  %1906 = vmatmul.f32.gmra.mxu3 %v3426_v16 }
 0x1df   : > { %2007 = vmatmul.f32.gmra.mxu1 %v3423_v15  ;;  %2033 = vmatpush.msra.mxu2 %v1657_v4 }
 0x1e0   : > { %2148 = vmatpush.msra.mxu0 %v1678_v61  ;;  %2430 = vmatpush.msra.mxu1 %v3461_v48 }
 0x1e1   : > { %2034 = vmatpush.msra.mxu2 %v1656_v5 }
 0x1e2   : > { %2186 = vmatpush.msrb.mxu0 %v3396_v29  ;;  %v1655_v29 = vld [vmem:[#allocation4 + $0x2c8] sm:$0xff] }
 0x1e3   : > { %v1490_v36 = vpop.f32.mrf.mxu3  ;;  %2035 = vmatpush.msra.mxu2 %v1655_v29 }
 0x1e4   : > { %v1491_v37 = vadd.f32 %v3299_v53, %v1490_v36  ;;  %2187 = vmatpush.msrb.mxu0 %v3401_v45  ;;  %v1654_v36 = vld [vmem:[#allocation4 + $0x2c0] sm:$0xff] }
 0x1e5   : > { %2036 = vmatpush.msra.mxu2 %v1654_v36 }
 0x1e6   : > { %v1502_v33 = vmul.f32 0.01, %v1491_v37  ;;  %2188 = vmatpush.msrb.mxu0 %v3405_v0 }
 0x1e8   : > { %v3448_v9 = vmax.f32 %v1491_v37, %v1502_v33  ;;  %2189 = vmatpush.msrb.mxu0 %v3408_v56 }
 0x1ea   : > { %3696 = vst [vmem:[#allocation10_spill] sm:$0xff] %v3448_v9  ;;  %2190 = vmatpush.msrb.mxu0 %v3411_v6 }
 0x1eb   : > { %1544 = vst [vmem:[#allocation3 + $0x71] sm:$0xff] %v3448_v9 }
 0x1ec   : > { %2191 = vmatpush.msrb.mxu0 %v3419_v12  ;;  %v1650_v12 = vld [vmem:[#allocation4 + $0x2a0] sm:$0xff] }
 0x1ee   : > { %2192 = vmatpush.msrb.mxu0 %v3428_v23  ;;  %v1648_v23 = vld [vmem:[#allocation4 + $0x290] sm:$0xff] }
 0x1f0   : > { %2193 = vmatpush.msrb.mxu0 %v3433_v25 }
 0x1f2   : > { %v3464_v62 = vld [vmem:[#allocation3 + $0x70] sm:$0xff]  ;;  %v1561_v11 = vld [vmem:[#allocation3 + $0x78] sm:$0x3]  ;;  %2194 = vmatpush.msrb.mxu0 %v3436_v28 }
 0x1f3   : > { %1955 = vmatmul.f32.gmra.mxu0 %v3464_v62  ;;  %v1747_v13 = vrot.slane %v3464_v62, 1  ;;  %v1748_v26 = vrot.slane %v1561_v11, 1  ;;  %v1861_v21 = vrot.slane %v3464_v62, 2  ;;  %v1862_v24 = vrot.slane %v1561_v11, 2 }
 0x1f4   : > { %2195 = vmatpush.msrb.mxu0 %v3439_v8  ;;  %v1775_v8 = vpop.f32.mrf.mxu1 }
 0x1f5   : > { %v3473_v20 = vsel %vm1093_vm3, %v1747_v13, %v1748_v26  ;;  %v3476_v63 = vsel %vm1142_vm4, %v1861_v21, %v1862_v24  ;;  %v1493_v34 = vpop.f32.mrf.mxu3 }
 0x1f6   : > { %1795 = vmatmul.f32.gmra.mxu2 %v3473_v20  ;;  %1909 = vmatmul.f32.gmra.mxu3 %v3476_v63  ;;  %v1494_v35 = vadd.f32 %v3299_v53, %v1493_v34  ;;  %v1653_v53 = vld [vmem:[#allocation4 + $0x2b8] sm:$0xff] }
 0x1f7   : > { %2010 = vmatmul.f32.gmra.mxu1 %v3473_v20  ;;  %2037 = vmatpush.msra.mxu2 %v1653_v53 }
 0x1f8   : > { %v1503_v45 = vmul.f32 0.01, %v1494_v35  ;;  %2196 = vmatpush.msrb.mxu0 %v3443_v43  ;;  %v3528_v25 = vpop.f32.mrf.mxu0 }
 0x1f9   : > { %2038 = vmatpush.msra.mxu2 %v1652_v44 }
 0x1fa   : > { %v3484_v37 = vmax.f32 %v1494_v35, %v1503_v45  ;;  %2197 = vmatpush.msrb.mxu0 %v3446_v54 }
 0x1fc   : > { %3697 = vst [vmem:[#allocation11_spill] sm:$0xff] %v3484_v37  ;;  %2198 = vmatpush.msrb.mxu0 %v3451_v60 }
 0x1fd   : > { %1545 = vst [vmem:[#allocation3 + $0x81] sm:$0xff] %v3484_v37  ;;  %v1889_v17 = vpop.f32.mrf.mxu3 }
 0x1fe   : > { %1815 = vmatmul.f32.vlgmr.msrb.gmra.mxu2 %v3275_v7  ;;  %2094 = vmatmul.f32.vlgmr.msra.gmra.mxu3 %v3327_v14  ;;  %v1651_v7 = vld [vmem:[#allocation4 + $0x2a8] sm:$0xff] }
 0x1ff   : > { %2039 = vmatpush.msra.mxu2 %v1651_v7  ;;  %2199 = vmatpush.msrb.mxu0 %v3455_v2 }
 0x200   : > { %v3533_v28 = vpop.f32.mrf.mxu0 }
 0x201   : > { %2040 = vmatpush.msra.mxu2 %v1650_v12  ;;  %2200 = vmatpush.msrb.mxu0 %v3458_v3 }
 0x203   : > { %2201 = vmatpush.msrb.mxu0 %v3461_v48 }
 0x204   : > { %v1562_v0 = vld [vmem:[#allocation3 + $0x80] sm:$0xff]  ;;  %v1563_v56 = vld [vmem:[#allocation3 + $0x88] sm:$0x3] }
 0x205   : > { %1958 = vmatmul.f32.gmra.mxu0 %v1562_v0  ;;  %v1972_v6 = vrot.slane %v1562_v0, 1  ;;  %v1973_v46 = vrot.slane %v1563_v56, 1  ;;  %v1892_v3 = vpop.f32.mrf.mxu3 }
 0x206   : > { %1818 = vmatmul.f32.gmra.mxu2 %v3316_v10  ;;  %2097 = vmatmul.f32.gmra.mxu3 %v3344_v32  ;;  %v1649_v10 = vld [vmem:[#allocation4 + $0x298] sm:$0xff] }
 0x207   : > { %v1974_v33 = vsel %vm1093_vm3, %v1972_v6, %v1973_v46  ;;  %2041 = vmatpush.msra.mxu2 %v1649_v10 }
 0x208   : > { %2013 = vmatmul.f32.gmra.mxu1 %v1974_v33 }
 0x209   : > { %2042 = vmatpush.msra.mxu2 %v1648_v23 }
 0x20d   : > { %2149 = vmatmul.f32.vlgmr.msra.gmra.mxu0 %v3333_v27  ;;  %v1646_v27 = vld [vmem:[#allocation4 + $0x280] sm:$0xff] }
 0x20e   : > { %1821 = vmatmul.f32.gmra.mxu2 %v3327_v14  ;;  %2100 = vmatmul.f32.gmra.mxu3 %v3367_v51  ;;  %v1647_v14 = vld [vmem:[#allocation4 + $0x288] sm:$0xff] }
 0x20f   : > { %2043 = vmatpush.msra.mxu2 %v1647_v14 }
 0x210   : > { %2205 = vmatmul.f32.vlgmr.msra.gmra.mxu1 %v3353_v39 }
 0x211   : > { %2044 = vmatpush.msra.mxu2 %v1646_v27 }
 0x212   : > { %v3536_v43 = vpop.f32.mrf.mxu0 }
 0x215   : > { %2152 = vmatmul.f32.gmra.mxu0 %v3350_v38  ;;  %v2026_v38 = vrot.slane %v1563_v56, 2 }
 0x216   : > { %1824 = vmatmul.f32.gmra.mxu2 %v3344_v32  ;;  %2103 = vmatmul.f32.gmra.mxu3 %v3378_v19  ;;  %v2025_v32 = vrot.slane %v1562_v0, 2 }
 0x218   : > { %2208 = vmatmul.f32.gmra.mxu1 %v3376_v58 }
 0x21d   : > { %2155 = vmatmul.f32.gmra.mxu0 %v3373_v40  ;;  %v2027_v40 = vsel %vm1142_vm4, %v2025_v32, %v2026_v38 }
 0x21e   : > { %1827 = vmatmul.f32.gmra.mxu2 %v3367_v51  ;;  %2106 = vmatmul.f32.gmra.mxu3 %v3414_v49  ;;  %v1564_v51 = vld [vmem:[#allocation3 + $0x90] sm:$0xff] }
 0x21f   : > { %v2182_v55 = vrot.slane %v1564_v51, 2 }
 0x220   : > { %2211 = vmatmul.f32.gmra.mxu1 %v3390_v22 }
 0x225   : > { %2158 = vmatmul.f32.gmra.mxu0 %v3387_v57  ;;  %v2129_v57 = vrot.slane %v1564_v51, 1 }
 0x226   : > { %1830 = vmatmul.f32.gmra.mxu2 %v3378_v19  ;;  %2109 = vmatmul.f32.gmra.mxu3 %v3464_v62  ;;  %v1565_v19 = vld [vmem:[#allocation3 + $0x98] sm:$0x3] }
 0x227   : > { %v2183_v59 = vrot.slane %v1565_v19, 2 }
 0x228   : > { %2214 = vmatmul.f32.gmra.mxu1 %v3426_v16 }
 0x22d   : > { %2161 = vmatmul.f32.gmra.mxu0 %v3423_v15 }
 0x22e   : > { %1833 = vmatmul.f32.gmra.mxu2 %v3414_v49  ;;  %2112 = vmatmul.f32.gmra.mxu3 %v1562_v0  ;;  %v2130_v49 = vrot.slane %v1565_v19, 1 }
 0x230   : > { %2217 = vmatmul.f32.gmra.mxu1 %v3476_v63  ;;  %v2131_v15 = vsel %vm1093_vm3, %v2129_v57, %v2130_v49 }
 0x235   : > { %2164 = vmatmul.f32.gmra.mxu0 %v3473_v20 }
 0x236   : > { %1836 = vmatmul.f32.gmra.mxu2 %v3464_v62  ;;  %2115 = vmatmul.f32.gmra.mxu3 %v1564_v51  ;;  %v1895_v62 = vpop.f32.mrf.mxu3 }
 0x238   : > { %2220 = vmatmul.f32.gmra.mxu1 %v2027_v40 }
 0x239   : > { %v3541_v54 = vpop.f32.mrf.mxu0 }
 0x23d   : > { %2167 = vmatmul.f32.gmra.mxu0 %v1974_v33 }
 0x23e   : > { %2045 = vmatmul.f32.vlgmr.msra.gmra.mxu2 %v3324_v18  ;;  %v1778_v18 = vpop.f32.mrf.mxu1  ;;  %v3554_v26 = vpop.f32.mrf.mxu3 }
 0x242   : > { %v3539_v52 = vpop.f32.mrf.mxu2 }
 0x245   : > { %2170 = vmatmul.f32.gmra.mxu0 %v2131_v15 }
 0x246   : > { %2048 = vmatmul.f32.gmra.mxu2 %v3338_v30 }
 0x24a   : > { %v3545_v60 = vpop.f32.mrf.mxu2 }
 0x24d   : > { %2202 = vmatmul.f32.vlgmr.msrb.gmra.mxu0 %v3338_v30  ;;  %v2184_v30 = vsel %vm1142_vm4, %v2182_v55, %v2183_v59 }
 0x24e   : > { %2051 = vmatmul.f32.gmra.mxu2 %v3353_v39  ;;  %2223 = vmatmul.f32.gmra.mxu1 %v2184_v30  ;;  %v1781_v39 = vpop.f32.mrf.mxu1 }
 0x256   : > { %2054 = vmatmul.f32.gmra.mxu2 %v3376_v58  ;;  %v3547_v58 = vpop.f32.mrf.mxu0 }
 0x25e   : > { %2057 = vmatmul.f32.gmra.mxu2 %v3390_v22  ;;  %v3550_v22 = vpop.f32.mrf.mxu1  ;;  %v3552_v61 = vpop.f32.mrf.mxu0 }
 0x261   : > { %v1793_v2 = vpop.f32.mrf.mxu2 }
 0x266   : > { %2060 = vmatmul.f32.gmra.mxu2 %v3426_v16  ;;  %v1993_v5 = vpop.f32.mrf.mxu1 }
 0x26e   : > { %2063 = vmatmul.f32.gmra.mxu2 %v3476_v63  ;;  %v1996_v13 = vpop.f32.mrf.mxu1  ;;  %v3558_v63 = vpop.f32.mrf.mxu3 }
 0x270   : > { %v1956_v48 = vpop.f32.mrf.mxu0 }
 0x276   : > { %2066 = vmatmul.f32.gmra.mxu2 %v2027_v40  ;;  %v3556_v20 = vpop.f32.mrf.mxu1  ;;  %v3564_v53 = vpop.f32.mrf.mxu3 }
 0x279   : > { %v1796_v4 = vpop.f32.mrf.mxu2 }
 0x27e   : > { %v3560_v35 = vpop.f32.mrf.mxu1  ;;  %v1907_v6 = vpop.f32.mrf.mxu3 }
 0x281   : > { %v1816_v16 = vpop.f32.mrf.mxu2 }
 0x282   : > { %v1959_v11 = vpop.f32.mrf.mxu0  ;;  %v1817_v32 = vadd.f32 %v1816_v16, %v1775_v8 }
 0x284   : > { %v1913_v19 = vadd.f32 %v1889_v17, %v1817_v32 }
 0x286   : > { %v3566_v44 = vpop.f32.mrf.mxu1  ;;  %v1910_v12 = vpop.f32.mrf.mxu3  ;;  %v1962_v37 = vadd.f32 %v3528_v25, %v1913_v19 }
 0x288   : > { %v2017_v8 = vadd.f32 %v1993_v5, %v1962_v37 }
 0x289   : > { %v1819_v21 = vpop.f32.mrf.mxu2 }
 0x28a   : > { %v2150_v24 = vpop.f32.mrf.mxu0  ;;  %v1820_v59 = vadd.f32 %v1819_v21, %v1778_v18 }
 0x28e   : > { %v3570_v46 = vpop.f32.mrf.mxu1  ;;  %v2095_v51 = vpop.f32.mrf.mxu3 }
 0x291   : > { %v1822_v34 = vpop.f32.mrf.mxu2 }
 0x292   : > { %v2153_v29 = vpop.f32.mrf.mxu0 }
 0x296   : > { %v3576_v10 = vpop.f32.mrf.mxu1 }
 0x299   : > { %v1825_v36 = vpop.f32.mrf.mxu2 }
 0x29a   : > { %v3562_v45 = vpop.f32.mrf.mxu0  ;;  %v1826_v19 = vadd.f32 %v1825_v36, %v3550_v22 }
 0x29e   : > { %v3582_v57 = vpop.f32.mrf.mxu1 }
 0x2a1   : > { %v1828_v0 = vpop.f32.mrf.mxu2 }
 0x2a2   : > { %v3568_v56 = vpop.f32.mrf.mxu0 }
 0x2a6   : > { %v2206_v17 = vpop.f32.mrf.mxu1 }
 0x2a9   : > { %v3572_v7 = vpop.f32.mrf.mxu2 }
 0x2aa   : > { %v3574_v33 = vpop.f32.mrf.mxu0 }
 0x2b1   : > { %v1834_v23 = vpop.f32.mrf.mxu2 }
 0x2b2   : > { %v1835_v14 = vadd.f32 %v1834_v23, %v1793_v2  ;;  %v3578_v27 = vpop.f32.mrf.mxu0  ;;  %v2098_v2 = vpop.f32.mrf.mxu3  ;;  %v1914_v23 = vadd.f32 %v1892_v3, %v1820_v59  ;;  %v3595_v3 = vld [vmem:[%s3690_s4] ss:$0 sm:$0xff] }
 0x2b4   : > { %v1919_v38 = vadd.f32 %v1907_v6, %v1835_v14  ;;  %v1823_v14 = vadd.f32 %v1822_v34, %v1781_v39 }
 0x2b6   : > { %v3580_v40 = vadd.f32 %v1956_v48, %v1919_v38  ;;  %v1915_v38 = vadd.f32 %v1895_v62, %v1823_v14  ;;  %v2209_v62 = vpop.f32.mrf.mxu1 }
 0x2b9   : > { %v1837_v49 = vpop.f32.mrf.mxu2 }
 0x2ba   : > { %v1838_v15 = vadd.f32 %v1837_v49, %v1796_v4  ;;  %v3584_v55 = vpop.f32.mrf.mxu0  ;;  %v1963_v4 = vadd.f32 %v3533_v28, %v1914_v23  ;;  %v2101_v21 = vpop.f32.mrf.mxu3  ;;  %v1964_v28 = vadd.f32 %v3536_v43, %v1915_v38  ;;  %v1916_v49 = vadd.f32 %v3554_v26, %v1826_v19 }
 0x2bb   : > { %v1829_v23 = vadd.f32 %v1828_v0, %v3539_v52 }
 0x2bc   : > { %v1920_v30 = vadd.f32 %v1910_v12, %v1838_v15  ;;  %v2018_v18 = vadd.f32 %v1996_v13, %v1963_v4 }
 0x2be   : > { %v3587_v9 = vadd.f32 %v1959_v11, %v1920_v30 }
 0x2c1   : > { %v2046_v16 = vpop.f32.mrf.mxu2 }
 0x2c2   : > { %v2070_v6 = vadd.f32 %v2046_v16, %v2017_v8  ;;  %v3589_v48 = vpop.f32.mrf.mxu0  ;;  %v1965_v16 = vadd.f32 %v3541_v54, %v1916_v49 }
 0x2c4   : > { %v2119_v32 = vadd.f32 %v2095_v51, %v2070_v6  ;;  %v2212_v6 = vpop.f32.mrf.mxu1  ;;  %v2020_v52 = vadd.f32 %v3560_v35, %v1965_v16 }
 0x2c6   : > { %v2174_v37 = vadd.f32 %v2150_v24, %v2119_v32  ;;  %v2019_v24 = vadd.f32 %v3556_v20, %v1964_v28  ;;  %v1832_v32 = vadd.f32 %v3572_v7, %v3545_v60 }
 0x2c9   : > { %v2049_v25 = vpop.f32.mrf.mxu2 }
 0x2ca   : > { %v2071_v5 = vadd.f32 %v2049_v25, %v2018_v18  ;;  %v2203_v11 = vpop.f32.mrf.mxu0  ;;  %v1918_v25 = vadd.f32 %v3564_v53, %v1832_v32  ;;  %v3699_v32 = vld [vmem:[#allocation11_spill] sm:$0xff] }
 0x2cb   : > { %v2227_v12 = vadd.f32 %v2203_v11, %v2174_v37 }
 0x2cc   : > { %v2120_v39 = vadd.f32 %v2098_v2, %v2071_v5  ;;  %v2104_v2 = vpop.f32.mrf.mxu3  ;;  %v2215_v11 = vpop.f32.mrf.mxu1 }
 0x2cd   : > { %v2239_v13 = vadd.f32 %v3595_v3, %v2227_v12 }
 0x2ce   : > { %v2175_v34 = vadd.f32 %v2153_v29, %v2120_v39  ;;  %v1967_v39 = vadd.f32 %v3552_v61, %v1918_v25 }
 0x2cf   : > { %v2247_v51 = vmul.f32 0.01, %v2239_v13 }
 0x2d0   : > { %v2228_v15 = vadd.f32 %v2206_v17, %v2175_v34  ;;  %v1917_v17 = vadd.f32 %v3558_v63, %v1829_v23 }
 0x2d1   : > { %v2255_v59 = vmax.f32 %v2239_v13, %v2247_v51  ;;  %v2052_v30 = vpop.f32.mrf.mxu2 }
 0x2d2   : > { %v2240_v22 = vadd.f32 %v3595_v3, %v2228_v15  ;;  %v2072_v36 = vadd.f32 %v2052_v30, %v2019_v24 }
 0x2d3   : > { %v2263_v43 = vadd.f32 %v2255_v59, %v3306_v1 }
 0x2d4   : > { %v2248_v8 = vmul.f32 0.01, %v2240_v22  ;;  %v2121_v29 = vadd.f32 %v2101_v21, %v2072_v36  ;;  %v2107_v21 = vpop.f32.mrf.mxu3  ;;  %v2218_v49 = vpop.f32.mrf.mxu1 }
 0x2d5   : > { %2271 = vst [vmem:[%s3609_s8] sm:$0xff] %v2263_v43 }
 0x2d6   : > { %v2256_v26 = vmax.f32 %v2240_v22, %v2248_v8  ;;  %v2176_v20 = vadd.f32 %v3562_v45, %v2121_v29  ;;  %v1966_v45 = vadd.f32 %v3547_v58, %v1917_v17 }
 0x2d8   : > { %v2264_v14 = vadd.f32 %v2256_v26, %v3314_v42  ;;  %v2229_v1 = vadd.f32 %v2209_v62, %v2176_v20  ;;  %v2021_v5 = vadd.f32 %v3566_v44, %v1966_v45  ;;  %v2022_v44 = vadd.f32 %v3570_v46, %v1967_v39 }
 0x2d9   : > { %v2055_v0 = vpop.f32.mrf.mxu2 }
 0x2da   : > { %2272 = vst [vmem:[%s3609_s8 + $0x8] sm:$0xff] %v2264_v14  ;;  %v2241_v54 = vadd.f32 %v3595_v3, %v2229_v1  ;;  %v2073_v4 = vadd.f32 %v2055_v0, %v2020_v52 }
 0x2dc   : > { %v2249_v38 = vmul.f32 0.01, %v2241_v54  ;;  %v2122_v18 = vadd.f32 %v2104_v2, %v2073_v4  ;;  %v2110_v53 = vpop.f32.mrf.mxu3  ;;  %v2221_v8 = vpop.f32.mrf.mxu1 }
 0x2de   : > { %v2257_v63 = vmax.f32 %v2241_v54, %v2249_v38  ;;  %v2177_v42 = vadd.f32 %v3568_v56, %v2122_v18 }
 0x2e0   : > { %v2265_v35 = vadd.f32 %v2257_v63, %v3341_v31  ;;  %v2230_v37 = vadd.f32 %v2212_v6, %v2177_v42 }
 0x2e1   : > { %v2058_v12 = vpop.f32.mrf.mxu2 }
 0x2e2   : > { %2273 = vst [vmem:[%s3609_s8 + $0x10] sm:$0xff] %v2265_v35  ;;  %v2242_v60 = vadd.f32 %v3595_v3, %v2230_v37  ;;  %v2074_v7 = vadd.f32 %v2058_v12, %v2021_v5 }
 0x2e4   : > { %v2250_v19 = vmul.f32 0.01, %v2242_v60  ;;  %v2123_v58 = vadd.f32 %v2107_v21, %v2074_v7  ;;  %v2113_v22 = vpop.f32.mrf.mxu3  ;;  %v2224_v1 = vpop.f32.mrf.mxu1 }
 0x2e6   : > { %v2258_v28 = vmax.f32 %v2242_v60, %v2250_v19  ;;  %v2178_v56 = vadd.f32 %v3574_v33, %v2123_v58 }
 0x2e8   : > { %v2266_v31 = vadd.f32 %v2258_v28, %v3361_v47  ;;  %v2231_v62 = vadd.f32 %v2215_v11, %v2178_v56  ;;  %v2023_v47 = vadd.f32 %v3576_v10, %v3580_v40  ;;  %v2024_v10 = vadd.f32 %v3582_v57, %v3587_v9 }
 0x2e9   : > { %v2061_v13 = vpop.f32.mrf.mxu2 }
 0x2ea   : > { %2274 = vst [vmem:[%s3609_s8 + $0x18] sm:$0xff] %v2266_v31  ;;  %v2243_v34 = vadd.f32 %v3595_v3, %v2231_v62  ;;  %v2075_v51 = vadd.f32 %v2061_v13, %v2022_v44 }
 0x2ec   : > { %v2251_v15 = vmul.f32 0.01, %v2243_v34  ;;  %v2124_v24 = vadd.f32 %v2110_v53, %v2075_v51  ;;  %v2116_v26 = vpop.f32.mrf.mxu3 }
 0x2ee   : > { %v2259_v59 = vmax.f32 %v2243_v34, %v2251_v15  ;;  %v2179_v61 = vadd.f32 %v3578_v27, %v2124_v24 }
 0x2f0   : > { %v2267_v33 = vadd.f32 %v2259_v59, %v3363_v50  ;;  %v2232_v30 = vadd.f32 %v2218_v49, %v2179_v61 }
 0x2f1   : > { %v2064_v46 = vpop.f32.mrf.mxu2 }
 0x2f2   : > { %2275 = vst [vmem:[%s3609_s8 + $0x20] sm:$0xff] %v2267_v33  ;;  %v2244_v36 = vadd.f32 %v3595_v3, %v2232_v30  ;;  %v2076_v2 = vadd.f32 %v2064_v46, %v2023_v47 }
 0x2f4   : > { %v2252_v43 = vmul.f32 0.01, %v2244_v36  ;;  %v2125_v23 = vadd.f32 %v2113_v22, %v2076_v2 }
 0x2f6   : > { %v2260_v29 = vmax.f32 %v2244_v36, %v2252_v43  ;;  %v2180_v27 = vadd.f32 %v3584_v55, %v2125_v23  ;;  %v3698_v55 = vld [vmem:[#allocation10_spill] sm:$0xff] }
 0x2f8   : > { %v2268_v50 = vadd.f32 %v2260_v29, %v3399_v41  ;;  %v2233_v16 = vadd.f32 %v2221_v8, %v2180_v27 }
 0x2f9   : > { %v2067_v40 = vpop.f32.mrf.mxu2 }
 0x2fa   : > { %2276 = vst [vmem:[%s3609_s8 + $0x28] sm:$0xff] %v2268_v50  ;;  %v2245_v20 = vadd.f32 %v3595_v3, %v2233_v16  ;;  %v2077_v6 = vadd.f32 %v2067_v40, %v2024_v10 }
 0x2fc   : > { %v2253_v17 = vmul.f32 0.01, %v2245_v20  ;;  %v2126_v14 = vadd.f32 %v2116_v26, %v2077_v6 }
 0x2fe   : > { %v2261_v52 = vmax.f32 %v2245_v20, %v2253_v17  ;;  %v2181_v41 = vadd.f32 %v3589_v48, %v2126_v14 }
 0x300   : > { %v2269_v0 = vadd.f32 %v2261_v52, %v3698_v55  ;;  %v2234_v54 = vadd.f32 %v2224_v1, %v2181_v41 }
 0x302   : > { %2277 = vst [vmem:[%s3609_s8 + $0x30] sm:$0xff] %v2269_v0  ;;  %v2246_v9 = vadd.f32 %v3595_v3, %v2234_v54 }
 0x304   : > { %v2254_v57 = vmul.f32 0.01, %v2246_v9 }
 0x306   : > { %v2262_v4 = vmax.f32 %v2246_v9, %v2254_v57 }
 0x308   : > { %v2270_v38 = vadd.f32 %v2262_v4, %v3699_v32 }
 0x30a   : > { %2278 = vst [vmem:[%s3609_s8 + $0x38] sm:$0xff] %v2270_v38 }
 0x30b   : > { %2556 = shalt.err (!%p2553_p8)
}
 0x30c   : > { %s2609_s6 = smov 128  }
 0x30d   : > { %2435 = dma.vmem_to_hbm [thread:$0]  (%p2678_p5), %s2293_s15, 1024, %s2295_s16, %s2280_s22, %s2609_s6, %s2609_s6, %s2602_s23  }
 0x30e PF: > { %p2447_p9 = scmp.ge.s32.totalorder %s2595_s21, 2  ;;  %s2309_s8 = sand.u32 1, %s2583_s18  }
 0x30f   : > { %s2310_s11 = scalar_lea.sflag [#allocation6], %s2309_s8 }
 0x310   : > { %p2442_p10 = pnand %p2447_p9, %p2682_p6 }
 0x312   : > { %p2443_p11 = pneg %p2442_p10 }
 0x314   : > { %2578 = dma.done.wait (%p2443_p11), %s2310_s11, 1024  }
 0x315   : > { %2580 = vsyncadd (%p2443_p11), %s2310_s11, 4294966272  ;;  %p16_p12 = scmp.ge.s32.totalorder %s2665_s24, 4   ;;  %s3700_s18 = smov %s2587_s19 }
 0x316   : > { %s3701_s19 = smov %s2591_s20  ;;  %s3702_s20 = smov %s2676_s27 }
 0x317   : > { %s3703_s21 = smov %s2665_s24  ;;  %18 = sbr.rel (!%p16_p12) target bundleno = 4 (0x4), region = 84 }
 0x31c   :  { %2316 = vsyncpa [#allocation5], 1 }
 0x31d   :  { %2318 = vsyncpa [#allocation5 + $0x1], 1 }
 0x31e   :  { %2319 = vsyncpa [#allocation6], 1 }
 0x31f   :  { %2321 = vsyncpa [#allocation6 + $0x1], 1 }

</bundles_post_ra>
